<compile_context>
chip_gen: v7x
topology: tpu7x:2x2x1
jax: 0.10.0
libtpu: 0.0.40
codegen_flags: <defaults>
</compile_context>

<pallas_src>
import functools

import jax
import jax.numpy as jnp
import numpy as np
from jax.experimental import pallas as pl
from jax.experimental.pallas import tpu as pltpu


# ----------------------------------------------------------------------------
# Generation-aware VMEM budgeting
# ----------------------------------------------------------------------------
def _vmem_limit_bytes():
    """Scoped VMEM limit to request: ~3/4 of physical, capped at 96 MiB."""
    try:
        cap = int(pltpu.get_tpu_info().vmem_capacity_bytes)
        return min((cap * 3) // 4, 96 * 1024 * 1024)
    except Exception:
        return None  # unknown generation: keep Mosaic's default scoped limit


def _compiler_params():
    limit = _vmem_limit_bytes()
    kwargs = dict(dimension_semantics=("parallel",))
    if limit is not None:
        kwargs["vmem_limit_bytes"] = limit
    return pltpu.CompilerParams(**kwargs)


def _check_block_fits(nbytes_blocks, nbytes_temps, what):
    # Declared blocks are double-buffered by the BlockSpec pipeline; in-kernel
    # temporaries (tap slab, f32 accumulator, GN temps) are single-buffered.
    budget = _vmem_limit_bytes() or (32 * 1024 * 1024)
    need = 2 * nbytes_blocks + nbytes_temps
    if need > budget:
        # TODO(synk): spatial row-band tiling + accumulator GroupNorm instead
        # of rejecting once a per-image block outgrows VMEM.
        raise ValueError(
            f"{what}: estimated VMEM need {need} B exceeds budget {budget} B; "
            f"spatial tiling is required.")


# ----------------------------------------------------------------------------
# Shared in-kernel GroupNorm (two-pass) + folded affine + SiLU on (M, C) f32.
# ----------------------------------------------------------------------------
def _gn_silu(y, gamma, beta, *, groups, eps):
    M, C = y.shape
    cpg = C // groups
    inv_count = 1.0 / float(M * cpg)

    s1 = jnp.sum(y, axis=0, keepdims=True)                         # (1, C)
    if cpg == 1:
        # C == groups: per-channel stats, no group mixing needed (demo config).
        mean_c = s1 * inv_count
        d = y - mean_c
        var_c = jnp.sum(d * d, axis=0, keepdims=True) * inv_count
    else:
        # Single block-constant projector P[i,j] = inv_count iff same group
        # (replaces the previous two chained membership matmuls per pass).
        same = (jax.lax.broadcasted_iota(jnp.int32, (C, C), 0) // cpg
                == jax.lax.broadcasted_iota(jnp.int32, (C, C), 1) // cpg)
        proj = same.astype(jnp.float32) * inv_count
        mean_c = jnp.dot(s1, proj, preferred_element_type=jnp.float32)
        d = y - mean_c
        s2 = jnp.sum(d * d, axis=0, keepdims=True)
        var_c = jnp.dot(s2, proj, preferred_element_type=jnp.float32)

    inv_c = jax.lax.rsqrt(var_c + eps)
    # Folded affine: one FMA-shaped (M, C)-wide op.
    scale = inv_c * gamma
    shift = beta - mean_c * scale
    z = y * scale + shift
    return z * jax.nn.sigmoid(z)   # SiLU


# ----------------------------------------------------------------------------
# Kernel A: (patches @ W + b) -> GN -> SiLU   (used for the 4x4 / stride-2 conv)
# ----------------------------------------------------------------------------
def _matmul_gn_silu_kernel(p_ref, w_ref, c_ref, o_ref, *, groups, eps):
    y = jnp.dot(p_ref[...], w_ref[...], preferred_element_type=jnp.float32)
    c = c_ref[...]                                   # (3, C) f32: [bias; g; be]
    y = y + c[0:1, :]
    z = _gn_silu(y, c[1:2, :], c[2:3, :], groups=groups, eps=eps)
    o_ref[...] = z.astype(o_ref.dtype)


# ----------------------------------------------------------------------------
# Kernel B: 3x3 conv (slab-hoisted taps) -> GN -> SiLU [-> + residual]
# ----------------------------------------------------------------------------
def _conv3x3_gn_silu_kernel(*refs, H, W, C, groups, eps, with_res):
    if with_res:
        xp_ref, w_ref, c_ref, res_ref, o_ref = refs
    else:
        xp_ref, w_ref, c_ref, o_ref = refs
        res_ref = None

    M = H * W
    acc = jnp.zeros((M, C), jnp.float32)
    # 3 column slabs (one per dj); each of the 9 taps is a contiguous
    # leading-dim slice of a slab feeding an accumulating MXU dot.  The padded
    # feature map is bf16 in VMEM already, so there is no per-tap cast.
    for dj in range(3):
        slab = xp_ref[:, dj:dj + W, :].reshape((H + 2) * W, C)     # bf16
        for di in range(3):
            tap = slab[di * W:di * W + M]                          # (M, C)
            acc = acc + jnp.dot(tap, w_ref[di * 3 + dj],
                                preferred_element_type=jnp.float32)

    c = c_ref[...]                                   # (3, C) f32: [bias; g; be]
    y = acc + c[0:1, :]
    z = _gn_silu(y, c[1:2, :], c[2:3, :], groups=groups, eps=eps)
    if res_ref is not None:
        z = z + res_ref[...].astype(jnp.float32)
    o_ref[...] = z.astype(o_ref.dtype)


# ----------------------------------------------------------------------------
# Wrappers
# ----------------------------------------------------------------------------
def conv_patches_gn_silu(patches, w, consts, *, groups, eps=1e-5,
                         out_dtype=jnp.bfloat16):
    """patches: (N, M, K) bf16, w: (K, C) bf16, consts: (3, C) f32 [b; g; be]."""
    N, M, K = patches.shape
    C = w.shape[1]
    if C % groups:
        raise ValueError(f"C={C} not divisible by groups={groups}")
    blocks = (M * K * 2 + K * C * 2 + 3 * C * 4
              + M * C * jnp.dtype(out_dtype).itemsize)
    temps = 4 * M * C * 4
    _check_block_fits(blocks, temps, "conv_patches_gn_silu")

    kernel = functools.partial(_matmul_gn_silu_kernel, groups=groups,
                               eps=float(eps))
    return pl.pallas_call(
        kernel,
        out_shape=jax.ShapeDtypeStruct((N, M, C), out_dtype),
        grid=(N,),
        in_specs=[
            pl.BlockSpec((None, M, K), lambda n: (n, 0, 0)),
            pl.BlockSpec((K, C), lambda n: (0, 0)),
            pl.BlockSpec((3, C), lambda n: (0, 0)),
        ],
        out_specs=pl.BlockSpec((None, M, C), lambda n: (n, 0, 0)),
        compiler_params=_compiler_params(),
    )(patches, w, consts)


def conv3x3_gn_silu(x_img, w9, consts, *, groups, residual=None, eps=1e-5,
                    out_dtype=jnp.bfloat16):
    """x_img: (N, H, W, C) bf16.  w9: (9, C, C) bf16, tap-major (HWIO order).
    consts: (3, C) f32 [bias; gamma; beta].
    residual: optional (N, H*W, C) bf16 added after SiLU."""
    N, H, W, C = x_img.shape
    if C % groups:
        raise ValueError(f"C={C} not divisible by groups={groups}")
    M = H * W
    blocks = ((H + 2) * (W + 2) * C * 2 + 9 * C * C * 2 + 3 * C * 4
              + M * C * jnp.dtype(out_dtype).itemsize
              + (M * C * 2 if residual is not None else 0))
    temps = (H + 2) * W * C * 2 + 5 * M * C * 4
    _check_block_fits(blocks, temps, "conv3x3_gn_silu")

    # Reflect halo pad in plain JAX on the bf16 map (glue; half the bytes of an
    # f32 padded copy).  TODO(synk): build the halo in VMEM instead.
    xp = jnp.pad(x_img, ((0, 0), (1, 1), (1, 1), (0, 0)), mode="reflect")

    inputs = [xp, w9, consts]
    in_specs = [
        pl.BlockSpec((None, H + 2, W + 2, C), lambda n: (n, 0, 0, 0)),
        pl.BlockSpec((9, C, C), lambda n: (0, 0, 0)),
        pl.BlockSpec((3, C), lambda n: (0, 0)),
    ]
    if residual is not None:
        inputs.append(residual)
        in_specs.append(pl.BlockSpec((None, M, C), lambda n: (n, 0, 0)))

    kernel = functools.partial(
        _conv3x3_gn_silu_kernel, H=H, W=W, C=C, groups=groups,
        eps=float(eps), with_res=residual is not None)

    return pl.pallas_call(
        kernel,
        out_shape=jax.ShapeDtypeStruct((N, M, C), out_dtype),
        grid=(N,),
        in_specs=in_specs,
        out_specs=pl.BlockSpec((None, M, C), lambda n: (n, 0, 0)),
        compiler_params=_compiler_params(),
    )(*inputs)


# ----------------------------------------------------------------------------
# JAX glue (reflect pad / im2col for the stride-2 4x4 conv only)
# ----------------------------------------------------------------------------
def reflect_pad(x, p):
    return jnp.pad(x, ((0, 0), (p, p), (p, p), (0, 0)), mode="reflect")


def im2col(xp, k, s):
    """xp: (N, Hp, Wp, Cin) padded -> (N, oh*ow, k*k*Cin), (kh, kw, Cin) order."""
    N, Hp, Wp, Cin = xp.shape
    out_h = (Hp - k) // s + 1
    out_w = (Wp - k) // s + 1
    cols = []
    for di in range(k):
        for dj in range(k):
            cols.append(xp[:, di:di + s * out_h:s, dj:dj + s * out_w:s, :])
    p = jnp.concatenate(cols, axis=-1)
    return p.reshape(N, out_h * out_w, k * k * Cin), out_h, out_w


# ----------------------------------------------------------------------------
# DownBlock forward
# ----------------------------------------------------------------------------
def down_block_forward(x_nhwc, params, groups=32):
    N = x_nhwc.shape[0]
    C = params["w1"].shape[-1]

    c1 = jnp.stack([params["b1"], params["g1"], params["be1"]])    # (3, C) f32
    c2 = jnp.stack([params["b2"], params["g2"], params["be2"]])
    c3 = jnp.stack([params["b3"], params["g3"], params["be3"]])

    # --- self.down: Conv2d(in, out, 4, 2, 1, reflect) -> GN(32) -> SiLU ------
    # The stride-2 4x4 conv keeps an im2col lowering: inflation is on the tiny
    # Cin-channel input (Cin=4 here), yielding one dense (M, 16*Cin) bf16 matmul.
    p1, oh, ow = im2col(reflect_pad(x_nhwc, 1), k=4, s=2)
    w1 = params["w1"].reshape(-1, C).astype(jnp.bfloat16)          # (16*Cin, C)
    h1 = conv_patches_gn_silu(p1.astype(jnp.bfloat16), w1, c1,
                              groups=groups)                       # (N, M, C) bf16
    h1_img = h1.reshape(N, oh, ow, C)

    # --- self.network[0:3]: Conv3x3(reflect) -> GN -> SiLU -------------------
    w2 = params["w2"].reshape(9, C, C).astype(jnp.bfloat16)
    h2 = conv3x3_gn_silu(h1_img, w2, c2, groups=groups)            # (N, M, C) bf16
    h2_img = h2.reshape(N, oh, ow, C)

    # --- self.network[3:6]: Conv3x3 -> GN -> SiLU, fused residual add (f32) --
    w3 = params["w3"].reshape(9, C, C).astype(jnp.bfloat16)
    out = conv3x3_gn_silu(h2_img, w3, c3, groups=groups, residual=h1,
                          out_dtype=jnp.float32)
    return out.reshape(N, oh, ow, C)


# ----------------------------------------------------------------------------
# Pure-JAX f32 reference (correctness check)
# ----------------------------------------------------------------------------
def _conv_ref(x, w, b, stride, pad):
    xp = reflect_pad(x, pad)
    y = jax.lax.conv_general_dilated(
        xp, w, (stride, stride), "VALID",
        dimension_numbers=("NHWC", "HWIO", "NHWC"))
    return y + b


def _gn_ref(x, gamma, beta, groups, eps=1e-5):
    N, H, W, C = x.shape
    xg = x.reshape(N, H, W, groups, C // groups)
    mean = xg.mean(axis=(1, 2, 4), keepdims=True)
    var = xg.var(axis=(1, 2, 4), keepdims=True)
    xn = ((xg - mean) / jnp.sqrt(var + eps)).reshape(N, H, W, C)
    return xn * gamma + beta


def _silu(x):
    return x * jax.nn.sigmoid(x)


def down_block_ref(x, p, groups=32):
    h = _silu(_gn_ref(_conv_ref(x, p["w1"], p["b1"], 2, 1), p["g1"], p["be1"], groups))
    y = _silu(_gn_ref(_conv_ref(h, p["w2"], p["b2"], 1, 1), p["g2"], p["be2"], groups))
    y = _silu(_gn_ref(_conv_ref(y, p["w3"], p["b3"], 1, 1), p["g3"], p["be3"], groups))
    return y + h


# ----------------------------------------------------------------------------
if __name__ == "__main__":
    key = jax.random.PRNGKey(0)
    k_x, k1, kb1, k2, kb2, k3, kb3 = jax.random.split(key, 7)

    N, H, W = 2, 16, 16
    C_IN, C_OUT = 4, 32            # GroupNorm(32, C_OUT) requires C_OUT % 32 == 0
    GROUPS = 32

    x = jax.random.normal(k_x, (N, H, W, C_IN), dtype=jnp.float32)

    # Weights stored HWIO (kh, kw, Cin, Cout).
    params = {
        "w1": jax.random.normal(k1, (4, 4, C_IN, C_OUT), jnp.float32) * 0.05,
        "b1": jax.random.normal(kb1, (C_OUT,), jnp.float32) * 0.05,
        "g1": jnp.ones((C_OUT,), jnp.float32),
        "be1": jnp.zeros((C_OUT,), jnp.float32),
        "w2": jax.random.normal(k2, (3, 3, C_OUT, C_OUT), jnp.float32) * 0.05,
        "b2": jax.random.normal(kb2, (C_OUT,), jnp.float32) * 0.05,
        "g2": jnp.ones((C_OUT,), jnp.float32),
        "be2": jnp.zeros((C_OUT,), jnp.float32),
        "w3": jax.random.normal(k3, (3, 3, C_OUT, C_OUT), jnp.float32) * 0.05,
        "b3": jax.random.normal(kb3, (C_OUT,), jnp.float32) * 0.05,
        "g3": jnp.ones((C_OUT,), jnp.float32),
        "be3": jnp.zeros((C_OUT,), jnp.float32),
    }

    out = jax.jit(down_block_forward)(x, params)
    out = jax.block_until_ready(out)
    assert out.shape == (N, H // 2, W // 2, C_OUT), out.shape

    ref = jax.block_until_ready(down_block_ref(x, params))
    # Tolerance reflects bf16 MXU inputs / bf16 inter-stage activations with
    # f32 accumulation + GN + SiLU; structural bugs produce far larger errors.
    np.testing.assert_allclose(np.asarray(out), np.asarray(ref),
                               rtol=5e-2, atol=5e-2)

    print("KERNEL_OK")
</pallas_src>

<mosaic_0001>
module attributes {stable_mosaic.version = 11 : i64} {
  func.func @_matmul_gn_silu_kernel(%arg0: i32, %arg1: memref<1x64x64xbf16, #tpu.memory_space<vmem>>, %arg2: memref<64x32xbf16, #tpu.memory_space<vmem>>, %arg3: memref<3x32xf32, #tpu.memory_space<vmem>>, %arg4: memref<1x64x32xbf16, #tpu.memory_space<vmem>>) attributes {dimension_semantics = [#tpu.dimension_semantics<parallel>], iteration_bounds = array<i64: 2>, scalar_prefetch = 0 : i64, scratch_operands = 0 : i64, tpu.core_type = #tpu.core_type<tc>, window_params = [{transform_indices = @transform_0, window_bounds = array<i64: 1, 64, 64>}, {pipeline_mode = #tpu.pipeline_mode<synchronous>, transform_indices = @transform_1, window_bounds = array<i64: 64, 32>}, {pipeline_mode = #tpu.pipeline_mode<synchronous>, transform_indices = @transform_2, window_bounds = array<i64: 3, 32>}, {transform_indices = @transform_3, window_bounds = array<i64: 1, 64, 32>}]} {
    %c0 = arith.constant 0 : index
    %c0_0 = arith.constant 0 : index
    %c0_1 = arith.constant 0 : index
    %0 = vector.load %arg1[%c0, %c0_0, %c0_1] : memref<1x64x64xbf16, #tpu.memory_space<vmem>>, vector<1x64x64xbf16>
    %1 = vector.shape_cast %0 : vector<1x64x64xbf16> to vector<64x64xbf16>
    %c0_2 = arith.constant 0 : index
    %c0_3 = arith.constant 0 : index
    %2 = vector.load %arg2[%c0_2, %c0_3] : memref<64x32xbf16, #tpu.memory_space<vmem>>, vector<64x32xbf16>
    %cst = arith.constant dense<0.000000e+00> : vector<64x32xf32>
    %3 = tpu.matmul %1, %2, %cst {dimension_numbers = #tpu.dot_dimension_numbers<[1], [0], [0], [1], [0, 0, 1, 1], [], []>} : vector<64x64xbf16>, vector<64x32xbf16>, vector<64x32xf32> -> vector<64x32xf32>
    %c0_4 = arith.constant 0 : index
    %c0_5 = arith.constant 0 : index
    %4 = vector.load %arg3[%c0_4, %c0_5] : memref<3x32xf32, #tpu.memory_space<vmem>>, vector<3x32xf32>
    %5 = vector.extract_strided_slice %4 {offsets = [0, 0], sizes = [1, 32], strides = [1, 1]} : vector<3x32xf32> to vector<1x32xf32>
    %6 = vector.broadcast %5 : vector<1x32xf32> to vector<64x32xf32>
    %7 = arith.addf %3, %6 : vector<64x32xf32>
    %8 = vector.extract_strided_slice %4 {offsets = [1, 0], sizes = [1, 32], strides = [1, 1]} : vector<3x32xf32> to vector<1x32xf32>
    %9 = vector.extract_strided_slice %4 {offsets = [2, 0], sizes = [1, 32], strides = [1, 1]} : vector<3x32xf32> to vector<1x32xf32>
    %cst_6 = arith.constant dense<0.000000e+00> : vector<32xf32>
    %10 = vector.multi_reduction <add>, %7, %cst_6 [0] : vector<64x32xf32> to vector<32xf32>
    %11 = vector.shape_cast %10 : vector<32xf32> to vector<1x32xf32>
    %cst_7 = arith.constant 1.562500e-02 : f32
    %12 = vector.broadcast %cst_7 : f32 to vector<1x32xf32>
    %13 = arith.mulf %11, %12 : vector<1x32xf32>
    %14 = vector.broadcast %13 : vector<1x32xf32> to vector<64x32xf32>
    %15 = arith.subf %7, %14 : vector<64x32xf32>
    %16 = arith.mulf %15, %15 : vector<64x32xf32>
    %cst_8 = arith.constant dense<0.000000e+00> : vector<32xf32>
    %17 = vector.multi_reduction <add>, %16, %cst_8 [0] : vector<64x32xf32> to vector<32xf32>
    %18 = vector.shape_cast %17 : vector<32xf32> to vector<1x32xf32>
    %cst_9 = arith.constant 1.562500e-02 : f32
    %19 = vector.broadcast %cst_9 : f32 to vector<1x32xf32>
    %20 = arith.mulf %18, %19 : vector<1x32xf32>
    %cst_10 = arith.constant 9.99999974E-6 : f32
    %21 = vector.broadcast %cst_10 : f32 to vector<1x32xf32>
    %22 = arith.addf %20, %21 : vector<1x32xf32>
    %23 = math.rsqrt %22 : vector<1x32xf32>
    %24 = arith.mulf %23, %8 : vector<1x32xf32>
    %25 = arith.mulf %13, %24 : vector<1x32xf32>
    %26 = arith.subf %9, %25 : vector<1x32xf32>
    %27 = vector.broadcast %24 : vector<1x32xf32> to vector<64x32xf32>
    %28 = arith.mulf %7, %27 : vector<64x32xf32>
    %29 = vector.broadcast %26 : vector<1x32xf32> to vector<64x32xf32>
    %30 = arith.addf %28, %29 : vector<64x32xf32>
    %31 = arith.negf %30 : vector<64x32xf32>
    %32 = math.exp %31 : vector<64x32xf32>
    %cst_11 = arith.constant 1.000000e+00 : f32
    %33 = vector.broadcast %cst_11 : f32 to vector<64x32xf32>
    %34 = arith.addf %33, %32 : vector<64x32xf32>
    %35 = arith.divf %33, %34 : vector<64x32xf32>
    %36 = arith.mulf %30, %35 : vector<64x32xf32>
    %37 = arith.truncf %36 : vector<64x32xf32> to vector<64x32xbf16>
    %c0_12 = arith.constant 0 : index
    %c0_13 = arith.constant 0 : index
    %c0_14 = arith.constant 0 : index
    %38 = vector.load %arg4[%c0_12, %c0_13, %c0_14] : memref<1x64x32xbf16, #tpu.memory_space<vmem>>, vector<1x64x32xbf16>
    %39 = vector.shape_cast %38 : vector<1x64x32xbf16> to vector<64x32xbf16>
    %40 = vector.shape_cast %37 : vector<64x32xbf16> to vector<1x64x32xbf16>
    tpu.vector_store %arg4[%c0_12, %c0_13, %c0_14], %40 {strides = array<i32>} : memref<1x64x32xbf16, #tpu.memory_space<vmem>>, vector<1x64x32xbf16>,
    return
  }
  func.func @transform_0(%arg0: i32) -> (i32, i32, i32) {
    %c0_i32 = arith.constant 0 : i32
    %c0_i32_0 = arith.constant 0 : i32
    %c0_i32_1 = arith.constant 0 : i32
    return %arg0, %c0_i32, %c0_i32_0 : i32, i32, i32
  }
  func.func @transform_1(%arg0: i32) -> (i32, i32) {
    %c0_i32 = arith.constant 0 : i32
    %c0_i32_0 = arith.constant 0 : i32
    %c0_i32_1 = arith.constant 0 : i32
    return %c0_i32, %c0_i32_0 : i32, i32
  }
  func.func @transform_2(%arg0: i32) -> (i32, i32) {
    %c0_i32 = arith.constant 0 : i32
    %c0_i32_0 = arith.constant 0 : i32
    %c0_i32_1 = arith.constant 0 : i32
    return %c0_i32, %c0_i32_0 : i32, i32
  }
  func.func @transform_3(%arg0: i32) -> (i32, i32, i32) {
    %c0_i32 = arith.constant 0 : i32
    %c0_i32_0 = arith.constant 0 : i32
    %c0_i32_1 = arith.constant 0 : i32
    return %arg0, %c0_i32, %c0_i32_0 : i32, i32, i32
  }
}

module attributes {stable_mosaic.version = 11 : i64} {
  func.func @_conv3x3_gn_silu_kernel(%arg0: i32, %arg1: memref<1x10x10x32xbf16, #tpu.memory_space<vmem>>, %arg2: memref<9x32x32xbf16, #tpu.memory_space<vmem>>, %arg3: memref<3x32xf32, #tpu.memory_space<vmem>>, %arg4: memref<1x64x32xbf16, #tpu.memory_space<vmem>>, %arg5: memref<1x64x32xf32, #tpu.memory_space<vmem>>) attributes {dimension_semantics = [#tpu.dimension_semantics<parallel>], iteration_bounds = array<i64: 2>, scalar_prefetch = 0 : i64, scratch_operands = 0 : i64, tpu.core_type = #tpu.core_type<tc>, window_params = [{transform_indices = @transform_0, window_bounds = array<i64: 1, 10, 10, 32>}, {pipeline_mode = #tpu.pipeline_mode<synchronous>, transform_indices = @transform_1, window_bounds = array<i64: 9, 32, 32>}, {pipeline_mode = #tpu.pipeline_mode<synchronous>, transform_indices = @transform_2, window_bounds = array<i64: 3, 32>}, {transform_indices = @transform_3, window_bounds = array<i64: 1, 64, 32>}, {transform_indices = @transform_4, window_bounds = array<i64: 1, 64, 32>}]} {
    %cst = arith.constant 0.000000e+00 : f32
    %0 = vector.broadcast %cst : f32 to vector<64x32xf32>
    %c0 = arith.constant 0 : index
    %c0_0 = arith.constant 0 : index
    %c0_1 = arith.constant 0 : index
    %c0_2 = arith.constant 0 : index
    %1 = vector.load %arg1[%c0, %c0_0, %c0_1, %c0_2] : memref<1x10x10x32xbf16, #tpu.memory_space<vmem>>, vector<1x10x8x32xbf16>
    %2 = vector.shape_cast %1 : vector<1x10x8x32xbf16> to vector<10x8x32xbf16>
    %3 = vector.shape_cast %2 : vector<10x8x32xbf16> to vector<80x32xbf16>
    %4 = vector.extract_strided_slice %3 {offsets = [0, 0], sizes = [64, 32], strides = [1, 1]} : vector<80x32xbf16> to vector<64x32xbf16>
    %c0_3 = arith.constant 0 : index
    %c0_4 = arith.constant 0 : index
    %c0_5 = arith.constant 0 : index
    %5 = vector.load %arg2[%c0_3, %c0_4, %c0_5] : memref<9x32x32xbf16, #tpu.memory_space<vmem>>, vector<1x32x32xbf16>
    %6 = vector.shape_cast %5 : vector<1x32x32xbf16> to vector<32x32xbf16>
    %cst_6 = arith.constant dense<0.000000e+00> : vector<64x32xf32>
    %7 = tpu.matmul %4, %6, %cst_6 {dimension_numbers = #tpu.dot_dimension_numbers<[1], [0], [0], [1], [0, 0, 1, 1], [], []>} : vector<64x32xbf16>, vector<32x32xbf16>, vector<64x32xf32> -> vector<64x32xf32>
    %8 = arith.addf %0, %7 : vector<64x32xf32>
    %9 = vector.extract_strided_slice %3 {offsets = [8, 0], sizes = [64, 32], strides = [1, 1]} : vector<80x32xbf16> to vector<64x32xbf16>
    %c3 = arith.constant 3 : index
    %c0_7 = arith.constant 0 : index
    %c0_8 = arith.constant 0 : index
    %10 = vector.load %arg2[%c3, %c0_7, %c0_8] : memref<9x32x32xbf16, #tpu.memory_space<vmem>>, vector<1x32x32xbf16>
    %11 = vector.shape_cast %10 : vector<1x32x32xbf16> to vector<32x32xbf16>
    %cst_9 = arith.constant dense<0.000000e+00> : vector<64x32xf32>
    %12 = tpu.matmul %9, %11, %cst_9 {dimension_numbers = #tpu.dot_dimension_numbers<[1], [0], [0], [1], [0, 0, 1, 1], [], []>} : vector<64x32xbf16>, vector<32x32xbf16>, vector<64x32xf32> -> vector<64x32xf32>
    %13 = arith.addf %8, %12 : vector<64x32xf32>
    %14 = vector.extract_strided_slice %3 {offsets = [16, 0], sizes = [64, 32], strides = [1, 1]} : vector<80x32xbf16> to vector<64x32xbf16>
    %c6 = arith.constant 6 : index
    %c0_10 = arith.constant 0 : index
    %c0_11 = arith.constant 0 : index
    %15 = vector.load %arg2[%c6, %c0_10, %c0_11] : memref<9x32x32xbf16, #tpu.memory_space<vmem>>, vector<1x32x32xbf16>
    %16 = vector.shape_cast %15 : vector<1x32x32xbf16> to vector<32x32xbf16>
    %cst_12 = arith.constant dense<0.000000e+00> : vector<64x32xf32>
    %17 = tpu.matmul %14, %16, %cst_12 {dimension_numbers = #tpu.dot_dimension_numbers<[1], [0], [0], [1], [0, 0, 1, 1], [], []>} : vector<64x32xbf16>, vector<32x32xbf16>, vector<64x32xf32> -> vector<64x32xf32>
    %18 = arith.addf %13, %17 : vector<64x32xf32>
    %c0_13 = arith.constant 0 : index
    %c0_14 = arith.constant 0 : index
    %c1 = arith.constant 1 : index
    %c0_15 = arith.constant 0 : index
    %19 = vector.load %arg1[%c0_13, %c0_14, %c1, %c0_15] : memref<1x10x10x32xbf16, #tpu.memory_space<vmem>>, vector<1x10x8x32xbf16>
    %20 = vector.shape_cast %19 : vector<1x10x8x32xbf16> to vector<10x8x32xbf16>
    %21 = vector.shape_cast %20 : vector<10x8x32xbf16> to vector<80x32xbf16>
    %22 = vector.extract_strided_slice %21 {offsets = [0, 0], sizes = [64, 32], strides = [1, 1]} : vector<80x32xbf16> to vector<64x32xbf16>
    %c1_16 = arith.constant 1 : index
    %c0_17 = arith.constant 0 : index
    %c0_18 = arith.constant 0 : index
    %23 = vector.load %arg2[%c1_16, %c0_17, %c0_18] : memref<9x32x32xbf16, #tpu.memory_space<vmem>>, vector<1x32x32xbf16>
    %24 = vector.shape_cast %23 : vector<1x32x32xbf16> to vector<32x32xbf16>
    %cst_19 = arith.constant dense<0.000000e+00> : vector<64x32xf32>
    %25 = tpu.matmul %22, %24, %cst_19 {dimension_numbers = #tpu.dot_dimension_numbers<[1], [0], [0], [1], [0, 0, 1, 1], [], []>} : vector<64x32xbf16>, vector<32x32xbf16>, vector<64x32xf32> -> vector<64x32xf32>
    %26 = arith.addf %18, %25 : vector<64x32xf32>
    %27 = vector.extract_strided_slice %21 {offsets = [8, 0], sizes = [64, 32], strides = [1, 1]} : vector<80x32xbf16> to vector<64x32xbf16>
    %c4 = arith.constant 4 : index
    %c0_20 = arith.constant 0 : index
    %c0_21 = arith.constant 0 : index
    %28 = vector.load %arg2[%c4, %c0_20, %c0_21] : memref<9x32x32xbf16, #tpu.memory_space<vmem>>, vector<1x32x32xbf16>
    %29 = vector.shape_cast %28 : vector<1x32x32xbf16> to vector<32x32xbf16>
    %cst_22 = arith.constant dense<0.000000e+00> : vector<64x32xf32>
    %30 = tpu.matmul %27, %29, %cst_22 {dimension_numbers = #tpu.dot_dimension_numbers<[1], [0], [0], [1], [0, 0, 1, 1], [], []>} : vector<64x32xbf16>, vector<32x32xbf16>, vector<64x32xf32> -> vector<64x32xf32>
    %31 = arith.addf %26, %30 : vector<64x32xf32>
    %32 = vector.extract_strided_slice %21 {offsets = [16, 0], sizes = [64, 32], strides = [1, 1]} : vector<80x32xbf16> to vector<64x32xbf16>
    %c7 = arith.constant 7 : index
    %c0_23 = arith.constant 0 : index
    %c0_24 = arith.constant 0 : index
    %33 = vector.load %arg2[%c7, %c0_23, %c0_24] : memref<9x32x32xbf16, #tpu.memory_space<vmem>>, vector<1x32x32xbf16>
    %34 = vector.shape_cast %33 : vector<1x32x32xbf16> to vector<32x32xbf16>
    %cst_25 = arith.constant dense<0.000000e+00> : vector<64x32xf32>
    %35 = tpu.matmul %32, %34, %cst_25 {dimension_numbers = #tpu.dot_dimension_numbers<[1], [0], [0], [1], [0, 0, 1, 1], [], []>} : vector<64x32xbf16>, vector<32x32xbf16>, vector<64x32xf32> -> vector<64x32xf32>
    %36 = arith.addf %31, %35 : vector<64x32xf32>
    %c0_26 = arith.constant 0 : index
    %c0_27 = arith.constant 0 : index
    %c2 = arith.constant 2 : index
    %c0_28 = arith.constant 0 : index
    %37 = vector.load %arg1[%c0_26, %c0_27, %c2, %c0_28] : memref<1x10x10x32xbf16, #tpu.memory_space<vmem>>, vector<1x10x8x32xbf16>
    %38 = vector.shape_cast %37 : vector<1x10x8x32xbf16> to vector<10x8x32xbf16>
    %39 = vector.shape_cast %38 : vector<10x8x32xbf16> to vector<80x32xbf16>
    %40 = vector.extract_strided_slice %39 {offsets = [0, 0], sizes = [64, 32], strides = [1, 1]} : vector<80x32xbf16> to vector<64x32xbf16>
    %c2_29 = arith.constant 2 : index
    %c0_30 = arith.constant 0 : index
    %c0_31 = arith.constant 0 : index
    %41 = vector.load %arg2[%c2_29, %c0_30, %c0_31] : memref<9x32x32xbf16, #tpu.memory_space<vmem>>, vector<1x32x32xbf16>
    %42 = vector.shape_cast %41 : vector<1x32x32xbf16> to vector<32x32xbf16>
    %cst_32 = arith.constant dense<0.000000e+00> : vector<64x32xf32>
    %43 = tpu.matmul %40, %42, %cst_32 {dimension_numbers = #tpu.dot_dimension_numbers<[1], [0], [0], [1], [0, 0, 1, 1], [], []>} : vector<64x32xbf16>, vector<32x32xbf16>, vector<64x32xf32> -> vector<64x32xf32>
    %44 = arith.addf %36, %43 : vector<64x32xf32>
    %45 = vector.extract_strided_slice %39 {offsets = [8, 0], sizes = [64, 32], strides = [1, 1]} : vector<80x32xbf16> to vector<64x32xbf16>
    %c5 = arith.constant 5 : index
    %c0_33 = arith.constant 0 : index
    %c0_34 = arith.constant 0 : index
    %46 = vector.load %arg2[%c5, %c0_33, %c0_34] : memref<9x32x32xbf16, #tpu.memory_space<vmem>>, vector<1x32x32xbf16>
    %47 = vector.shape_cast %46 : vector<1x32x32xbf16> to vector<32x32xbf16>
    %cst_35 = arith.constant dense<0.000000e+00> : vector<64x32xf32>
    %48 = tpu.matmul %45, %47, %cst_35 {dimension_numbers = #tpu.dot_dimension_numbers<[1], [0], [0], [1], [0, 0, 1, 1], [], []>} : vector<64x32xbf16>, vector<32x32xbf16>, vector<64x32xf32> -> vector<64x32xf32>
    %49 = arith.addf %44, %48 : vector<64x32xf32>
    %50 = vector.extract_strided_slice %39 {offsets = [16, 0], sizes = [64, 32], strides = [1, 1]} : vector<80x32xbf16> to vector<64x32xbf16>
    %c8 = arith.constant 8 : index
    %c0_36 = arith.constant 0 : index
    %c0_37 = arith.constant 0 : index
    %51 = vector.load %arg2[%c8, %c0_36, %c0_37] : memref<9x32x32xbf16, #tpu.memory_space<vmem>>, vector<1x32x32xbf16>
    %52 = vector.shape_cast %51 : vector<1x32x32xbf16> to vector<32x32xbf16>
    %cst_38 = arith.constant dense<0.000000e+00> : vector<64x32xf32>
    %53 = tpu.matmul %50, %52, %cst_38 {dimension_numbers = #tpu.dot_dimension_numbers<[1], [0], [0], [1], [0, 0, 1, 1], [], []>} : vector<64x32xbf16>, vector<32x32xbf16>, vector<64x32xf32> -> vector<64x32xf32>
    %54 = arith.addf %49, %53 : vector<64x32xf32>
    %c0_39 = arith.constant 0 : index
    %c0_40 = arith.constant 0 : index
    %55 = vector.load %arg3[%c0_39, %c0_40] : memref<3x32xf32, #tpu.memory_space<vmem>>, vector<3x32xf32>
    %56 = vector.extract_strided_slice %55 {offsets = [0, 0], sizes = [1, 32], strides = [1, 1]} : vector<3x32xf32> to vector<1x32xf32>
    %57 = vector.broadcast %56 : vector<1x32xf32> to vector<64x32xf32>
    %58 = arith.addf %54, %57 : vector<64x32xf32>
    %59 = vector.extract_strided_slice %55 {offsets = [1, 0], sizes = [1, 32], strides = [1, 1]} : vector<3x32xf32> to vector<1x32xf32>
    %60 = vector.extract_strided_slice %55 {offsets = [2, 0], sizes = [1, 32], strides = [1, 1]} : vector<3x32xf32> to vector<1x32xf32>
    %cst_41 = arith.constant dense<0.000000e+00> : vector<32xf32>
    %61 = vector.multi_reduction <add>, %58, %cst_41 [0] : vector<64x32xf32> to vector<32xf32>
    %62 = vector.shape_cast %61 : vector<32xf32> to vector<1x32xf32>
    %cst_42 = arith.constant 1.562500e-02 : f32
    %63 = vector.broadcast %cst_42 : f32 to vector<1x32xf32>
    %64 = arith.mulf %62, %63 : vector<1x32xf32>
    %65 = vector.broadcast %64 : vector<1x32xf32> to vector<64x32xf32>
    %66 = arith.subf %58, %65 : vector<64x32xf32>
    %67 = arith.mulf %66, %66 : vector<64x32xf32>
    %cst_43 = arith.constant dense<0.000000e+00> : vector<32xf32>
    %68 = vector.multi_reduction <add>, %67, %cst_43 [0] : vector<64x32xf32> to vector<32xf32>
    %69 = vector.shape_cast %68 : vector<32xf32> to vector<1x32xf32>
    %cst_44 = arith.constant 1.562500e-02 : f32
    %70 = vector.broadcast %cst_44 : f32 to vector<1x32xf32>
    %71 = arith.mulf %69, %70 : vector<1x32xf32>
    %cst_45 = arith.constant 9.99999974E-6 : f32
    %72 = vector.broadcast %cst_45 : f32 to vector<1x32xf32>
    %73 = arith.addf %71, %72 : vector<1x32xf32>
    %74 = math.rsqrt %73 : vector<1x32xf32>
    %75 = arith.mulf %74, %59 : vector<1x32xf32>
    %76 = arith.mulf %64, %75 : vector<1x32xf32>
    %77 = arith.subf %60, %76 : vector<1x32xf32>
    %78 = vector.broadcast %75 : vector<1x32xf32> to vector<64x32xf32>
    %79 = arith.mulf %58, %78 : vector<64x32xf32>
    %80 = vector.broadcast %77 : vector<1x32xf32> to vector<64x32xf32>
    %81 = arith.addf %79, %80 : vector<64x32xf32>
    %82 = arith.negf %81 : vector<64x32xf32>
    %83 = math.exp %82 : vector<64x32xf32>
    %cst_46 = arith.constant 1.000000e+00 : f32
    %84 = vector.broadcast %cst_46 : f32 to vector<64x32xf32>
    %85 = arith.addf %84, %83 : vector<64x32xf32>
    %86 = arith.divf %84, %85 : vector<64x32xf32>
    %87 = arith.mulf %81, %86 : vector<64x32xf32>
    %c0_47 = arith.constant 0 : index
    %c0_48 = arith.constant 0 : index
    %c0_49 = arith.constant 0 : index
    %88 = vector.load %arg4[%c0_47, %c0_48, %c0_49] : memref<1x64x32xbf16, #tpu.memory_space<vmem>>, vector<1x64x32xbf16>
    %89 = vector.shape_cast %88 : vector<1x64x32xbf16> to vector<64x32xbf16>
    %90 = arith.extf %89 : vector<64x32xbf16> to vector<64x32xf32>
    %91 = arith.addf %87, %90 : vector<64x32xf32>
    %c0_50 = arith.constant 0 : index
    %c0_51 = arith.constant 0 : index
    %c0_52 = arith.constant 0 : index
    %92 = vector.load %arg5[%c0_50, %c0_51, %c0_52] : memref<1x64x32xf32, #tpu.memory_space<vmem>>, vector<1x64x32xf32>
    %93 = vector.shape_cast %92 : vector<1x64x32xf32> to vector<64x32xf32>
    %94 = vector.shape_cast %91 : vector<64x32xf32> to vector<1x64x32xf32>
    tpu.vector_store %arg5[%c0_50, %c0_51, %c0_52], %94 {strides = array<i32>} : memref<1x64x32xf32, #tpu.memory_space<vmem>>, vector<1x64x32xf32>,
    return
  }
  func.func @transform_0(%arg0: i32) -> (i32, i32, i32, i32) {
    %c0_i32 = arith.constant 0 : i32
    %c0_i32_0 = arith.constant 0 : i32
    %c0_i32_1 = arith.constant 0 : i32
    %c0_i32_2 = arith.constant 0 : i32
    return %arg0, %c0_i32, %c0_i32_0, %c0_i32_1 : i32, i32, i32, i32
  }
  func.func @transform_1(%arg0: i32) -> (i32, i32, i32) {
    %c0_i32 = arith.constant 0 : i32
    %c0_i32_0 = arith.constant 0 : i32
    %c0_i32_1 = arith.constant 0 : i32
    %c0_i32_2 = arith.constant 0 : i32
    return %c0_i32, %c0_i32_0, %c0_i32_1 : i32, i32, i32
  }
  func.func @transform_2(%arg0: i32) -> (i32, i32) {
    %c0_i32 = arith.constant 0 : i32
    %c0_i32_0 = arith.constant 0 : i32
    %c0_i32_1 = arith.constant 0 : i32
    return %c0_i32, %c0_i32_0 : i32, i32
  }
  func.func @transform_3(%arg0: i32) -> (i32, i32, i32) {
    %c0_i32 = arith.constant 0 : i32
    %c0_i32_0 = arith.constant 0 : i32
    %c0_i32_1 = arith.constant 0 : i32
    return %arg0, %c0_i32, %c0_i32_0 : i32, i32, i32
  }
  func.func @transform_4(%arg0: i32) -> (i32, i32, i32) {
    %c0_i32 = arith.constant 0 : i32
    %c0_i32_0 = arith.constant 0 : i32
    %c0_i32_1 = arith.constant 0 : i32
    return %arg0, %c0_i32, %c0_i32_0 : i32, i32, i32
  }
}

module attributes {stable_mosaic.version = 11 : i64} {
  func.func @_conv3x3_gn_silu_kernel(%arg0: i32, %arg1: memref<1x10x10x32xbf16, #tpu.memory_space<vmem>>, %arg2: memref<9x32x32xbf16, #tpu.memory_space<vmem>>, %arg3: memref<3x32xf32, #tpu.memory_space<vmem>>, %arg4: memref<1x64x32xbf16, #tpu.memory_space<vmem>>) attributes {dimension_semantics = [#tpu.dimension_semantics<parallel>], iteration_bounds = array<i64: 2>, scalar_prefetch = 0 : i64, scratch_operands = 0 : i64, tpu.core_type = #tpu.core_type<tc>, window_params = [{transform_indices = @transform_0, window_bounds = array<i64: 1, 10, 10, 32>}, {pipeline_mode = #tpu.pipeline_mode<synchronous>, transform_indices = @transform_1, window_bounds = array<i64: 9, 32, 32>}, {pipeline_mode = #tpu.pipeline_mode<synchronous>, transform_indices = @transform_2, window_bounds = array<i64: 3, 32>}, {transform_indices = @transform_3, window_bounds = array<i64: 1, 64, 32>}]} {
    %cst = arith.constant 0.000000e+00 : f32
    %0 = vector.broadcast %cst : f32 to vector<64x32xf32>
    %c0 = arith.constant 0 : index
    %c0_0 = arith.constant 0 : index
    %c0_1 = arith.constant 0 : index
    %c0_2 = arith.constant 0 : index
    %1 = vector.load %arg1[%c0, %c0_0, %c0_1, %c0_2] : memref<1x10x10x32xbf16, #tpu.memory_space<vmem>>, vector<1x10x8x32xbf16>
    %2 = vector.shape_cast %1 : vector<1x10x8x32xbf16> to vector<10x8x32xbf16>
    %3 = vector.shape_cast %2 : vector<10x8x32xbf16> to vector<80x32xbf16>
    %4 = vector.extract_strided_slice %3 {offsets = [0, 0], sizes = [64, 32], strides = [1, 1]} : vector<80x32xbf16> to vector<64x32xbf16>
    %c0_3 = arith.constant 0 : index
    %c0_4 = arith.constant 0 : index
    %c0_5 = arith.constant 0 : index
    %5 = vector.load %arg2[%c0_3, %c0_4, %c0_5] : memref<9x32x32xbf16, #tpu.memory_space<vmem>>, vector<1x32x32xbf16>
    %6 = vector.shape_cast %5 : vector<1x32x32xbf16> to vector<32x32xbf16>
    %cst_6 = arith.constant dense<0.000000e+00> : vector<64x32xf32>
    %7 = tpu.matmul %4, %6, %cst_6 {dimension_numbers = #tpu.dot_dimension_numbers<[1], [0], [0], [1], [0, 0, 1, 1], [], []>} : vector<64x32xbf16>, vector<32x32xbf16>, vector<64x32xf32> -> vector<64x32xf32>
    %8 = arith.addf %0, %7 : vector<64x32xf32>
    %9 = vector.extract_strided_slice %3 {offsets = [8, 0], sizes = [64, 32], strides = [1, 1]} : vector<80x32xbf16> to vector<64x32xbf16>
    %c3 = arith.constant 3 : index
    %c0_7 = arith.constant 0 : index
    %c0_8 = arith.constant 0 : index
    %10 = vector.load %arg2[%c3, %c0_7, %c0_8] : memref<9x32x32xbf16, #tpu.memory_space<vmem>>, vector<1x32x32xbf16>
    %11 = vector.shape_cast %10 : vector<1x32x32xbf16> to vector<32x32xbf16>
    %cst_9 = arith.constant dense<0.000000e+00> : vector<64x32xf32>
    %12 = tpu.matmul %9, %11, %cst_9 {dimension_numbers = #tpu.dot_dimension_numbers<[1], [0], [0], [1], [0, 0, 1, 1], [], []>} : vector<64x32xbf16>, vector<32x32xbf16>, vector<64x32xf32> -> vector<64x32xf32>
    %13 = arith.addf %8, %12 : vector<64x32xf32>
    %14 = vector.extract_strided_slice %3 {offsets = [16, 0], sizes = [64, 32], strides = [1, 1]} : vector<80x32xbf16> to vector<64x32xbf16>
    %c6 = arith.constant 6 : index
    %c0_10 = arith.constant 0 : index
    %c0_11 = arith.constant 0 : index
    %15 = vector.load %arg2[%c6, %c0_10, %c0_11] : memref<9x32x32xbf16, #tpu.memory_space<vmem>>, vector<1x32x32xbf16>
    %16 = vector.shape_cast %15 : vector<1x32x32xbf16> to vector<32x32xbf16>
    %cst_12 = arith.constant dense<0.000000e+00> : vector<64x32xf32>
    %17 = tpu.matmul %14, %16, %cst_12 {dimension_numbers = #tpu.dot_dimension_numbers<[1], [0], [0], [1], [0, 0, 1, 1], [], []>} : vector<64x32xbf16>, vector<32x32xbf16>, vector<64x32xf32> -> vector<64x32xf32>
    %18 = arith.addf %13, %17 : vector<64x32xf32>
    %c0_13 = arith.constant 0 : index
    %c0_14 = arith.constant 0 : index
    %c1 = arith.constant 1 : index
    %c0_15 = arith.constant 0 : index
    %19 = vector.load %arg1[%c0_13, %c0_14, %c1, %c0_15] : memref<1x10x10x32xbf16, #tpu.memory_space<vmem>>, vector<1x10x8x32xbf16>
    %20 = vector.shape_cast %19 : vector<1x10x8x32xbf16> to vector<10x8x32xbf16>
    %21 = vector.shape_cast %20 : vector<10x8x32xbf16> to vector<80x32xbf16>
    %22 = vector.extract_strided_slice %21 {offsets = [0, 0], sizes = [64, 32], strides = [1, 1]} : vector<80x32xbf16> to vector<64x32xbf16>
    %c1_16 = arith.constant 1 : index
    %c0_17 = arith.constant 0 : index
    %c0_18 = arith.constant 0 : index
    %23 = vector.load %arg2[%c1_16, %c0_17, %c0_18] : memref<9x32x32xbf16, #tpu.memory_space<vmem>>, vector<1x32x32xbf16>
    %24 = vector.shape_cast %23 : vector<1x32x32xbf16> to vector<32x32xbf16>
    %cst_19 = arith.constant dense<0.000000e+00> : vector<64x32xf32>
    %25 = tpu.matmul %22, %24, %cst_19 {dimension_numbers = #tpu.dot_dimension_numbers<[1], [0], [0], [1], [0, 0, 1, 1], [], []>} : vector<64x32xbf16>, vector<32x32xbf16>, vector<64x32xf32> -> vector<64x32xf32>
    %26 = arith.addf %18, %25 : vector<64x32xf32>
    %27 = vector.extract_strided_slice %21 {offsets = [8, 0], sizes = [64, 32], strides = [1, 1]} : vector<80x32xbf16> to vector<64x32xbf16>
    %c4 = arith.constant 4 : index
    %c0_20 = arith.constant 0 : index
    %c0_21 = arith.constant 0 : index
    %28 = vector.load %arg2[%c4, %c0_20, %c0_21] : memref<9x32x32xbf16, #tpu.memory_space<vmem>>, vector<1x32x32xbf16>
    %29 = vector.shape_cast %28 : vector<1x32x32xbf16> to vector<32x32xbf16>
    %cst_22 = arith.constant dense<0.000000e+00> : vector<64x32xf32>
    %30 = tpu.matmul %27, %29, %cst_22 {dimension_numbers = #tpu.dot_dimension_numbers<[1], [0], [0], [1], [0, 0, 1, 1], [], []>} : vector<64x32xbf16>, vector<32x32xbf16>, vector<64x32xf32> -> vector<64x32xf32>
    %31 = arith.addf %26, %30 : vector<64x32xf32>
    %32 = vector.extract_strided_slice %21 {offsets = [16, 0], sizes = [64, 32], strides = [1, 1]} : vector<80x32xbf16> to vector<64x32xbf16>
    %c7 = arith.constant 7 : index
    %c0_23 = arith.constant 0 : index
    %c0_24 = arith.constant 0 : index
    %33 = vector.load %arg2[%c7, %c0_23, %c0_24] : memref<9x32x32xbf16, #tpu.memory_space<vmem>>, vector<1x32x32xbf16>
    %34 = vector.shape_cast %33 : vector<1x32x32xbf16> to vector<32x32xbf16>
    %cst_25 = arith.constant dense<0.000000e+00> : vector<64x32xf32>
    %35 = tpu.matmul %32, %34, %cst_25 {dimension_numbers = #tpu.dot_dimension_numbers<[1], [0], [0], [1], [0, 0, 1, 1], [], []>} : vector<64x32xbf16>, vector<32x32xbf16>, vector<64x32xf32> -> vector<64x32xf32>
    %36 = arith.addf %31, %35 : vector<64x32xf32>
    %c0_26 = arith.constant 0 : index
    %c0_27 = arith.constant 0 : index
    %c2 = arith.constant 2 : index
    %c0_28 = arith.constant 0 : index
    %37 = vector.load %arg1[%c0_26, %c0_27, %c2, %c0_28] : memref<1x10x10x32xbf16, #tpu.memory_space<vmem>>, vector<1x10x8x32xbf16>
    %38 = vector.shape_cast %37 : vector<1x10x8x32xbf16> to vector<10x8x32xbf16>
    %39 = vector.shape_cast %38 : vector<10x8x32xbf16> to vector<80x32xbf16>
    %40 = vector.extract_strided_slice %39 {offsets = [0, 0], sizes = [64, 32], strides = [1, 1]} : vector<80x32xbf16> to vector<64x32xbf16>
    %c2_29 = arith.constant 2 : index
    %c0_30 = arith.constant 0 : index
    %c0_31 = arith.constant 0 : index
    %41 = vector.load %arg2[%c2_29, %c0_30, %c0_31] : memref<9x32x32xbf16, #tpu.memory_space<vmem>>, vector<1x32x32xbf16>
    %42 = vector.shape_cast %41 : vector<1x32x32xbf16> to vector<32x32xbf16>
    %cst_32 = arith.constant dense<0.000000e+00> : vector<64x32xf32>
    %43 = tpu.matmul %40, %42, %cst_32 {dimension_numbers = #tpu.dot_dimension_numbers<[1], [0], [0], [1], [0, 0, 1, 1], [], []>} : vector<64x32xbf16>, vector<32x32xbf16>, vector<64x32xf32> -> vector<64x32xf32>
    %44 = arith.addf %36, %43 : vector<64x32xf32>
    %45 = vector.extract_strided_slice %39 {offsets = [8, 0], sizes = [64, 32], strides = [1, 1]} : vector<80x32xbf16> to vector<64x32xbf16>
    %c5 = arith.constant 5 : index
    %c0_33 = arith.constant 0 : index
    %c0_34 = arith.constant 0 : index
    %46 = vector.load %arg2[%c5, %c0_33, %c0_34] : memref<9x32x32xbf16, #tpu.memory_space<vmem>>, vector<1x32x32xbf16>
    %47 = vector.shape_cast %46 : vector<1x32x32xbf16> to vector<32x32xbf16>
    %cst_35 = arith.constant dense<0.000000e+00> : vector<64x32xf32>
    %48 = tpu.matmul %45, %47, %cst_35 {dimension_numbers = #tpu.dot_dimension_numbers<[1], [0], [0], [1], [0, 0, 1, 1], [], []>} : vector<64x32xbf16>, vector<32x32xbf16>, vector<64x32xf32> -> vector<64x32xf32>
    %49 = arith.addf %44, %48 : vector<64x32xf32>
    %50 = vector.extract_strided_slice %39 {offsets = [16, 0], sizes = [64, 32], strides = [1, 1]} : vector<80x32xbf16> to vector<64x32xbf16>
    %c8 = arith.constant 8 : index
    %c0_36 = arith.constant 0 : index
    %c0_37 = arith.constant 0 : index
    %51 = vector.load %arg2[%c8, %c0_36, %c0_37] : memref<9x32x32xbf16, #tpu.memory_space<vmem>>, vector<1x32x32xbf16>
    %52 = vector.shape_cast %51 : vector<1x32x32xbf16> to vector<32x32xbf16>
    %cst_38 = arith.constant dense<0.000000e+00> : vector<64x32xf32>
    %53 = tpu.matmul %50, %52, %cst_38 {dimension_numbers = #tpu.dot_dimension_numbers<[1], [0], [0], [1], [0, 0, 1, 1], [], []>} : vector<64x32xbf16>, vector<32x32xbf16>, vector<64x32xf32> -> vector<64x32xf32>
    %54 = arith.addf %49, %53 : vector<64x32xf32>
    %c0_39 = arith.constant 0 : index
    %c0_40 = arith.constant 0 : index
    %55 = vector.load %arg3[%c0_39, %c0_40] : memref<3x32xf32, #tpu.memory_space<vmem>>, vector<3x32xf32>
    %56 = vector.extract_strided_slice %55 {offsets = [0, 0], sizes = [1, 32], strides = [1, 1]} : vector<3x32xf32> to vector<1x32xf32>
    %57 = vector.broadcast %56 : vector<1x32xf32> to vector<64x32xf32>
    %58 = arith.addf %54, %57 : vector<64x32xf32>
    %59 = vector.extract_strided_slice %55 {offsets = [1, 0], sizes = [1, 32], strides = [1, 1]} : vector<3x32xf32> to vector<1x32xf32>
    %60 = vector.extract_strided_slice %55 {offsets = [2, 0], sizes = [1, 32], strides = [1, 1]} : vector<3x32xf32> to vector<1x32xf32>
    %cst_41 = arith.constant dense<0.000000e+00> : vector<32xf32>
    %61 = vector.multi_reduction <add>, %58, %cst_41 [0] : vector<64x32xf32> to vector<32xf32>
    %62 = vector.shape_cast %61 : vector<32xf32> to vector<1x32xf32>
    %cst_42 = arith.constant 1.562500e-02 : f32
    %63 = vector.broadcast %cst_42 : f32 to vector<1x32xf32>
    %64 = arith.mulf %62, %63 : vector<1x32xf32>
    %65 = vector.broadcast %64 : vector<1x32xf32> to vector<64x32xf32>
    %66 = arith.subf %58, %65 : vector<64x32xf32>
    %67 = arith.mulf %66, %66 : vector<64x32xf32>
    %cst_43 = arith.constant dense<0.000000e+00> : vector<32xf32>
    %68 = vector.multi_reduction <add>, %67, %cst_43 [0] : vector<64x32xf32> to vector<32xf32>
    %69 = vector.shape_cast %68 : vector<32xf32> to vector<1x32xf32>
    %cst_44 = arith.constant 1.562500e-02 : f32
    %70 = vector.broadcast %cst_44 : f32 to vector<1x32xf32>
    %71 = arith.mulf %69, %70 : vector<1x32xf32>
    %cst_45 = arith.constant 9.99999974E-6 : f32
    %72 = vector.broadcast %cst_45 : f32 to vector<1x32xf32>
    %73 = arith.addf %71, %72 : vector<1x32xf32>
    %74 = math.rsqrt %73 : vector<1x32xf32>
    %75 = arith.mulf %74, %59 : vector<1x32xf32>
    %76 = arith.mulf %64, %75 : vector<1x32xf32>
    %77 = arith.subf %60, %76 : vector<1x32xf32>
    %78 = vector.broadcast %75 : vector<1x32xf32> to vector<64x32xf32>
    %79 = arith.mulf %58, %78 : vector<64x32xf32>
    %80 = vector.broadcast %77 : vector<1x32xf32> to vector<64x32xf32>
    %81 = arith.addf %79, %80 : vector<64x32xf32>
    %82 = arith.negf %81 : vector<64x32xf32>
    %83 = math.exp %82 : vector<64x32xf32>
    %cst_46 = arith.constant 1.000000e+00 : f32
    %84 = vector.broadcast %cst_46 : f32 to vector<64x32xf32>
    %85 = arith.addf %84, %83 : vector<64x32xf32>
    %86 = arith.divf %84, %85 : vector<64x32xf32>
    %87 = arith.mulf %81, %86 : vector<64x32xf32>
    %88 = arith.truncf %87 : vector<64x32xf32> to vector<64x32xbf16>
    %c0_47 = arith.constant 0 : index
    %c0_48 = arith.constant 0 : index
    %c0_49 = arith.constant 0 : index
    %89 = vector.load %arg4[%c0_47, %c0_48, %c0_49] : memref<1x64x32xbf16, #tpu.memory_space<vmem>>, vector<1x64x32xbf16>
    %90 = vector.shape_cast %89 : vector<1x64x32xbf16> to vector<64x32xbf16>
    %91 = vector.shape_cast %88 : vector<64x32xbf16> to vector<1x64x32xbf16>
    tpu.vector_store %arg4[%c0_47, %c0_48, %c0_49], %91 {strides = array<i32>} : memref<1x64x32xbf16, #tpu.memory_space<vmem>>, vector<1x64x32xbf16>,
    return
  }
  func.func @transform_0(%arg0: i32) -> (i32, i32, i32, i32) {
    %c0_i32 = arith.constant 0 : i32
    %c0_i32_0 = arith.constant 0 : i32
    %c0_i32_1 = arith.constant 0 : i32
    %c0_i32_2 = arith.constant 0 : i32
    return %arg0, %c0_i32, %c0_i32_0, %c0_i32_1 : i32, i32, i32, i32
  }
  func.func @transform_1(%arg0: i32) -> (i32, i32, i32) {
    %c0_i32 = arith.constant 0 : i32
    %c0_i32_0 = arith.constant 0 : i32
    %c0_i32_1 = arith.constant 0 : i32
    %c0_i32_2 = arith.constant 0 : i32
    return %c0_i32, %c0_i32_0, %c0_i32_1 : i32, i32, i32
  }
  func.func @transform_2(%arg0: i32) -> (i32, i32) {
    %c0_i32 = arith.constant 0 : i32
    %c0_i32_0 = arith.constant 0 : i32
    %c0_i32_1 = arith.constant 0 : i32
    return %c0_i32, %c0_i32_0 : i32, i32
  }
  func.func @transform_3(%arg0: i32) -> (i32, i32, i32) {
    %c0_i32 = arith.constant 0 : i32
    %c0_i32_0 = arith.constant 0 : i32
    %c0_i32_1 = arith.constant 0 : i32
    return %arg0, %c0_i32, %c0_i32_0 : i32, i32, i32
  }
}

</mosaic_0001>

<bundles_post_ra>
// kernel: down_block_forward.3
= control target key start
LH: loop header
LB: loop body
LE: loop exit
PB: predicated region body
PF: predicated region fallthrough
CT: control target
= control target key end

     0   :  { %s719_s12 = smov 0   ;;  %s844_s0 = inlined_call_operand.vmem [shape: bf16[2,64,64], index: 0, kind: input, shape index: {}]   ;;  %s845_s1 = inlined_call_operand.vmem [shape: bf16[64,32], index: 1, kind: input, shape index: {}]   ;;  %s846_s2 = inlined_call_operand.vmem [shape: f32[3,32], index: 2, kind: input, shape index: {}]   ;;  %s847_s3 = inlined_call_operand.vmem [shape: bf16[2,64,32], index: 3, kind: output, shape index: {}]  }
   0x1 LB: > { %s560_s13 = sadd.s32 4294967295, %s697_s12   ;;  %p564_p0 = scmp.ge.s32.totalorder %s697_s12, 1  ;;  %s697_s12 = sphi %s719_s12, %s13_s12  }
   0x2   : > { %p137_p1 = scmp.lt.s32.totalorder %s697_s12, 3 }
   0x4   : > { %p138_p2 = pnand %p564_p0, %p137_p1 }
   0x5   : > { %v649_v0 = vld [vmem:[%s845_s1] sm:$0xff] (!%p138_p2)   ;;  %p161_p3 = scmp.lt.s32.totalorder (!%p138_p2), %s560_s13, 1  ;;  %v650_v1 = vld [vmem:[%s845_s1 + $0x8] sm:$0xff] (!%p138_p2)   ;;  %v651_v2 = vld [vmem:[%s845_s1 + $0x10] sm:$0xff] (!%p138_p2)   ;;  %vm237_vm0 = vcmask (!%p138_p2), 523264   ;;  %v189_v8 = vlaneseq (!%p138_p2)  ;;  %vm315_vm1 = vcmask (!%p138_p2), 261120  }
   0x6   : > { %141 = sbr.rel (%p138_p2) target bundleno = 364 (0x16c), region = 32  ;;  %617 = vmatprep.subr.bf16.mxu0 (!%p138_p2), %v649_v0  ;;  %633 = vmatprep.subr.bf16.mxu1 (!%p138_p2), %v649_v0  ;;  %v652_v4 = vld [vmem:[%s845_s1 + $0x18] sm:$0xff] (!%p138_p2)   ;;  %v757_v11 = vld [vmem:[%s846_s2] sm:$0x7] (!%p138_p2)  ;;  %vm496_vm2 = vcmask (!%p138_p2), 257024  }
   0x7   : > { %618 = vmatpush3.bf16.msra.mxu0 (!%p138_p2), %v649_v0  ;;  %637 = vmatpush3.bf16.msra.mxu1 (!%p138_p2), %v649_v0  ;;  %v751_v9 = vshrl.u32 (!%p138_p2), %v189_v8, 7 }
   0x8   : > { %619 = vmatprep.subr.bf16.mxu0 (!%p138_p2), %v650_v1  ;;  %634 = vmatprep.subr.bf16.mxu1 (!%p138_p2), %v650_v1 }
   0x9   : > { %v191_v10 = vsub.s32 (!%p138_p2), 0, %v751_v9 }
   0xb   : > { %620 = vmatpush3.bf16.msra.mxu0 (!%p138_p2), %v650_v1  ;;  %638 = vmatpush3.bf16.msra.mxu1 (!%p138_p2), %v650_v1  ;;  %v192_v12 = vrot.slane (!%p138_p2), %v757_v11, %v191_v10 }
   0xc   : > { %621 = vmatprep.subr.bf16.mxu0 (!%p138_p2), %v651_v2  ;;  %635 = vmatprep.subr.bf16.mxu1 (!%p138_p2), %v651_v2 }
   0xd   : > { %s849_s13 = smov (!%p161_p3, %s560_s13), 1 }
   0xe   : > { %s599_s20 = sshll.u32 %s849_s13, 5 }
   0xf   : > { %s165_s23 = scalar_lea.vmem %s844_s0, %s599_s20  ;;  %622 = vmatpush3.bf16.msra.mxu0 %v651_v2  ;;  %639 = vmatpush3.bf16.msra.mxu1 %v651_v2  ;;  %s170_s30 = scalar_lea.vmem %s847_s3, %s599_s20 }
  0x10   : > { %v653_v3 = vld [vmem:[%s165_s23] sm:$0xff]   ;;  %v655_v5 = vld [vmem:[%s165_s23 + $0x10] sm:$0xff]   ;;  %623 = vmatprep.subr.bf16.mxu0 %v652_v4  ;;  %636 = vmatprep.subr.bf16.mxu1 %v652_v4  ;;  %v654_v6 = vld [vmem:[%s165_s23 + $0x8] sm:$0xff]  }
  0x11   : > { %625 = vmatprep.mubr.msk.bf16.mxu0 %vm237_vm0, %v653_v3  ;;  %629 = vmatprep.mubr.msk.bf16.mxu1 %vm237_vm0, %v655_v5  ;;  %v656_v7 = vld [vmem:[%s165_s23 + $0x18] sm:$0xff]  }
  0x13   : > { %624 = vmatpush3.bf16.msra.mxu0 %v652_v4  ;;  %640 = vmatpush3.bf16.msra.mxu1 %v652_v4 }
  0x16   : > { %626 = vmatmul.mubr.msk.bf16.vlgmr.msra.gmra.mrb[0].mxu0 %vm237_vm0, %v654_v6  ;;  %630 = vmatmul.mubr.msk.bf16.vlgmr.msra.gmra.mrb[0].mxu1 %vm237_vm0, %v656_v7 }
  0xe9   : > { %v627_v13 = vpop.f32.mrb[0].mxu0  ;;  %v631_v14 = vpop.f32.mrb[0].mxu1 }
  0xea   : > { %v284_v15 = vpop.f32.mrb[1].mxu0  ;;  %v300_v16 = vpop.f32.mrb[1].mxu1  ;;  %v762_v22 = vadd.f32 %v627_v13, %v192_v12  ;;  %v782_v35 = vadd.f32 %v631_v14, %v192_v12 }
  0xeb   : > { %v760_v17 = vadd.f32 %v284_v15, %v192_v12  ;;  %v628_v18 = vpop.f32.mrb[2].mxu0  ;;  %v632_v19 = vpop.f32.mrb[2].mxu1  ;;  %v772_v27 = vadd.f32 %v300_v16, %v192_v12 }
  0xec   : > { %v287_v20 = vpop.f32.mrb[3].mxu0  ;;  %v303_v21 = vpop.f32.mrb[3].mxu1  ;;  %v768_v25 = vadd.f32 %v628_v18, %v192_v12  ;;  %v319_v29 = vsel %vm315_vm1, %v762_v22, 0.0  ;;  %v784_v37 = vadd.f32 %v632_v19, %v192_v12  ;;  %v327_v40 = vsel %vm315_vm1, %v782_v35, 0.0 }
  0xed   : > { %v764_v23 = vadd.f32 %v287_v20, %v192_v12  ;;  %v316_v24 = vsel %vm315_vm1, %v760_v17, 0.0  ;;  %v323_v32 = vsel %vm315_vm1, %v772_v27, 0.0  ;;  %v780_v33 = vadd.f32 %v303_v21, %v192_v12 }
  0xee   : > { %v321_v31 = vsel %vm315_vm1, %v768_v25, 0.0  ;;  %v329_v42 = vsel %vm315_vm1, %v784_v37, 0.0 }
  0xef   : > { %v317_v26 = vsel %vm315_vm1, %v764_v23, 0.0  ;;  %v325_v38 = vsel %vm315_vm1, %v780_v33, 0.0 }
  0xf0   : > { %v318_v28 = vadd.f32 %v317_v26, %v316_v24 }
  0xf2   : > { %v320_v30 = vadd.f32 %v319_v29, %v318_v28 }
  0xf4   : > { %v322_v34 = vadd.f32 %v321_v31, %v320_v30 }
  0xf6   : > { %v324_v36 = vadd.f32 %v323_v32, %v322_v34 }
  0xf8   : > { %v326_v39 = vadd.f32 %v325_v38, %v324_v36  ;;  %v386_v36 = vsub.s32 1, %v751_v9 }
  0xfa   : > { %v328_v41 = vadd.f32 %v327_v40, %v326_v39 }
  0xfc   : > { %v330_v43 = vadd.f32 %v329_v42, %v328_v41  ;;  %v398_v42 = vsub.s32 2, %v751_v9 }
  0xfe   : > { %v331_v44 = vrot.slane %v330_v43, 4 }
 0x100   : > { %v332_v45 = vadd.f32 %v331_v44, %v330_v43 }
 0x102   : > { %v333_v46 = vrot.slane %v332_v45, 2 }
 0x104   : > { %v334_v47 = vadd.f32 %v333_v46, %v332_v45 }
 0x106   : > { %v335_v48 = vrot.slane %v334_v47, 1 }
 0x108   : > { %v336_v49 = vadd.f32 %v335_v48, %v334_v47 }
 0x10a   : > { %v337_v50 = vmul.f32 0.015625, %v336_v49 }
 0x10c   : > { %v338_v51 = vsub.f32 %v760_v17, %v337_v50  ;;  %v339_v52 = vsub.f32 %v764_v23, %v337_v50  ;;  %v340_v53 = vsub.f32 %v762_v22, %v337_v50  ;;  %v341_v54 = vsub.f32 %v768_v25, %v337_v50 }
 0x10d   : > { %v342_v55 = vsub.f32 %v772_v27, %v337_v50  ;;  %v343_v59 = vsub.f32 %v780_v33, %v337_v50  ;;  %v344_v0 = vsub.f32 %v782_v35, %v337_v50  ;;  %v345_v4 = vsub.f32 %v784_v37, %v337_v50 }
 0x10e   : > { %v346_v56 = vmul.f32 %v338_v51, %v338_v51  ;;  %v347_v57 = vmul.f32 %v339_v52, %v339_v52  ;;  %v348_v58 = vmul.f32 %v340_v53, %v340_v53  ;;  %v349_v60 = vmul.f32 %v341_v54, %v341_v54 }
 0x10f   : > { %v350_v1 = vmul.f32 %v342_v55, %v342_v55  ;;  %v351_v5 = vmul.f32 %v343_v59, %v343_v59  ;;  %v352_v8 = vmul.f32 %v344_v0, %v344_v0  ;;  %v353_v13 = vmul.f32 %v345_v4, %v345_v4 }
 0x110   : > { %v354_v61 = vsel %vm315_vm1, %v346_v56, 0.0  ;;  %v355_v62 = vsel %vm315_vm1, %v347_v57, 0.0  ;;  %v357_v2 = vsel %vm315_vm1, %v348_v58, 0.0  ;;  %v359_v6 = vsel %vm315_vm1, %v349_v60, 0.0 }
 0x111   : > { %v356_v63 = vadd.f32 %v355_v62, %v354_v61  ;;  %v361_v10 = vsel %vm315_vm1, %v350_v1, 0.0  ;;  %v363_v14 = vsel %vm315_vm1, %v351_v5, 0.0  ;;  %v365_v16 = vsel %vm315_vm1, %v352_v8, 0.0 }
 0x112   : > { %v367_v19 = vsel %vm315_vm1, %v353_v13, 0.0 }
 0x113   : > { %v358_v3 = vadd.f32 %v357_v2, %v356_v63 }
 0x115   : > { %v360_v7 = vadd.f32 %v359_v6, %v358_v3 }
 0x117   : > { %v362_v12 = vadd.f32 %v361_v10, %v360_v7 }
 0x119   : > { %v364_v15 = vadd.f32 %v363_v14, %v362_v12 }
 0x11b   : > { %v366_v18 = vadd.f32 %v365_v16, %v364_v15 }
 0x11d   : > { %v368_v20 = vadd.f32 %v367_v19, %v366_v18 }
 0x11f   : > { %v369_v21 = vrot.slane %v368_v20, 4 }
 0x121   : > { %v370_v24 = vadd.f32 %v369_v21, %v368_v20 }
 0x123   : > { %v371_v26 = vrot.slane %v370_v24, 2 }
 0x125   : > { %v372_v28 = vadd.f32 %v371_v26, %v370_v24 }
 0x127   : > { %v373_v29 = vrot.slane %v372_v28, 1 }
 0x129   : > { %v374_v30 = vadd.f32 %v373_v29, %v372_v28 }
 0x12b   : > { %v375_v31 = vmul.f32 0.015625, %v374_v30 }
 0x12d   : > { %v376_v32 = vadd.f32 1e-05, %v375_v31 }
 0x12f   : > { %657 = vrsqrt.f32 %v376_v32 }
 0x139   : > { %v658_v34 = vpop.eup %657 }
 0x13a   : > { %v378_v38 = vmul.f32 %v658_v34, %v757_v11 }
 0x13c   : > { %v379_v39 = vmul.f32 %v378_v38, %v337_v50  ;;  %v387_v40 = vrot.slane %v378_v38, %v386_v36 }
 0x13e   : > { %v381_v41 = vrot.slane %v379_v39, 7  ;;  %v388_v44 = vmul.f32 %v387_v40, %v760_v17  ;;  %v389_v45 = vmul.f32 %v387_v40, %v764_v23  ;;  %v390_v46 = vmul.f32 %v387_v40, %v762_v22 }
 0x13f   : > { %v391_v47 = vmul.f32 %v387_v40, %v768_v25  ;;  %v392_v49 = vmul.f32 %v387_v40, %v772_v27  ;;  %v393_v51 = vmul.f32 %v387_v40, %v780_v33  ;;  %v394_v50 = vmul.f32 %v387_v40, %v782_v35 }
 0x140   : > { %v383_v43 = vsub.f32 %v757_v11, %v381_v41  ;;  %v395_v11 = vmul.f32 %v387_v40, %v784_v37 }
 0x142   : > { %v399_v48 = vrot.slane %v383_v43, %v398_v42 }
 0x144   : > { %v400_v52 = vadd.f32 %v399_v48, %v388_v44  ;;  %v401_v53 = vadd.f32 %v399_v48, %v389_v45  ;;  %v402_v9 = vadd.f32 %v399_v48, %v390_v46  ;;  %v403_v54 = vadd.f32 %v399_v48, %v391_v47 }
 0x145   : > { %v404_v17 = vadd.f32 %v399_v48, %v392_v49  ;;  %v405_v55 = vadd.f32 %v399_v48, %v393_v51  ;;  %v820_v23 = vadd.f32 %v399_v48, %v394_v50  ;;  %v822_v57 = vadd.f32 %v399_v48, %v395_v11 }
 0x146   : > { %v581_v22 = vmul.f32 -1.442695, %v400_v52  ;;  %v582_v56 = vmul.f32 -1.442695, %v401_v53  ;;  %v583_v25 = vmul.f32 -1.442695, %v402_v9 }
 0x147   : > { %v584_v27 = vmul.f32 -1.442695, %v403_v54  ;;  %v585_v33 = vmul.f32 -1.442695, %v404_v17  ;;  %v586_v35 = vmul.f32 -1.442695, %v405_v55 }
 0x148   : > { %659 = vpow2.f32 %v581_v22  ;;  %v587_v58 = vmul.f32 -1.442695, %v820_v23  ;;  %v588_v37 = vmul.f32 -1.442695, %v822_v57 }
 0x149   : > { %661 = vpow2.f32 %v582_v56 }
 0x14a   : > { %663 = vpow2.f32 %v583_v25 }
 0x14b   : > { %665 = vpow2.f32 %v584_v27 }
 0x14c   : > { %667 = vpow2.f32 %v585_v33 }
 0x14d   : > { %669 = vpow2.f32 %v586_v35 }
 0x14e   : > { %671 = vpow2.f32 %v587_v58 }
 0x14f   : > { %673 = vpow2.f32 %v588_v37 }
 0x152   : > { %v660_v59 = vpop.eup %659 }
 0x153   : > { %v662_v60 = vpop.eup %661  ;;  %v432_v61 = vadd.f32 1.0, %v660_v59 }
 0x154   : > { %v664_v62 = vpop.eup %663  ;;  %v433_v63 = vadd.f32 1.0, %v662_v60 }
 0x155   : > { %v666_v0 = vpop.eup %665  ;;  %v434_v1 = vadd.f32 1.0, %v664_v62  ;;  %675 = vrcp.f32 %v432_v61 }
 0x156   : > { %v668_v2 = vpop.eup %667  ;;  %v435_v3 = vadd.f32 1.0, %v666_v0  ;;  %677 = vrcp.f32 %v433_v63 }
 0x157   : > { %v670_v4 = vpop.eup %669  ;;  %v436_v5 = vadd.f32 1.0, %v668_v2  ;;  %679 = vrcp.f32 %v434_v1 }
 0x158   : > { %v672_v6 = vpop.eup %671  ;;  %v437_v7 = vadd.f32 1.0, %v670_v4  ;;  %681 = vrcp.f32 %v435_v3 }
 0x159   : > { %v674_v8 = vpop.eup %673  ;;  %v438_v10 = vadd.f32 1.0, %v672_v6  ;;  %683 = vrcp.f32 %v436_v5 }
 0x15a   : > { %v439_v12 = vadd.f32 1.0, %v674_v8  ;;  %685 = vrcp.f32 %v437_v7 }
 0x15b   : > { %687 = vrcp.f32 %v438_v10 }
 0x15c   : > { %689 = vrcp.f32 %v439_v12 }
 0x15f   : > { %v676_v13 = vpop.eup %675 }
 0x160   : > { %v678_v14 = vpop.eup %677  ;;  %v456_v15 = vmul.f32 %v676_v13, %v400_v52 }
 0x161   : > { %v680_v16 = vpop.eup %679  ;;  %v457_v18 = vmul.f32 %v678_v14, %v401_v53 }
 0x162   : > { %v682_v19 = vpop.eup %681  ;;  %v458_v20 = vmul.f32 %v680_v16, %v402_v9  ;;  %v601_v21 = vpack.c.bf16 %v456_v15, %v456_v15 }
 0x163   : > { %v684_v24 = vpop.eup %683  ;;  %v459_v26 = vmul.f32 %v682_v19, %v403_v54  ;;  %v602_v28 = vpack.c.bf16 %v457_v18, %v457_v18 }
 0x164   : > { %v686_v29 = vpop.eup %685  ;;  %v460_v30 = vmul.f32 %v684_v24, %v404_v17  ;;  %v603_v31 = vpack.c.bf16 %v458_v20, %v458_v20  ;;  %497 = vst.msk [vmem:[%s170_s30] sm:$0xf] %vm496_vm2, %v601_v21 }
 0x165   : > { %v688_v32 = vpop.eup %687  ;;  %v461_v34 = vmul.f32 %v686_v29, %v405_v55  ;;  %v604_v36 = vpack.c.bf16 %v459_v26, %v459_v26  ;;  %498 = vst.msk [vmem:[%s170_s30 + $0x4] sm:$0xf] %vm496_vm2, %v602_v28 }
 0x166   : > { %v690_v38 = vpop.eup %689  ;;  %v462_v39 = vmul.f32 %v688_v32, %v820_v23  ;;  %v605_v40 = vpack.c.bf16 %v460_v30, %v460_v30  ;;  %499 = vst.msk [vmem:[%s170_s30 + $0x8] sm:$0xf] %vm496_vm2, %v603_v31 }
 0x167   : > { %v463_v41 = vmul.f32 %v690_v38, %v822_v57  ;;  %v606_v42 = vpack.c.bf16 %v461_v34, %v461_v34  ;;  %500 = vst.msk [vmem:[%s170_s30 + $0xc] sm:$0xf] %vm496_vm2, %v604_v36 }
 0x168   : > { %v607_v43 = vpack.c.bf16 %v462_v39, %v462_v39  ;;  %501 = vst.msk [vmem:[%s170_s30 + $0x10] sm:$0xf] %vm496_vm2, %v605_v40 }
 0x169   : > { %v608_v44 = vpack.c.bf16 %v463_v41, %v463_v41  ;;  %502 = vst.msk [vmem:[%s170_s30 + $0x14] sm:$0xf] %vm496_vm2, %v606_v42 }
 0x16a   : > { %503 = vst.msk [vmem:[%s170_s30 + $0x18] sm:$0xf] %vm496_vm2, %v607_v43 }
 0x16b   : > { %504 = vst.msk [vmem:[%s170_s30 + $0x1c] sm:$0xf] %vm496_vm2, %v608_v44 }
 0x16c PF: > { %s13_s12 = sadd.s32 1, %s697_s12  }
 0x16d   : > { %p10_p4 = scmp.ge.s32.totalorder %s13_s12, 4  }
 0x16f   :  { %12 = sbr.rel (!%p10_p4) target bundleno = 1 (0x1), region = 62 }

// kernel: down_block_forward.5
= control target key start
LH: loop header
LB: loop body
LE: loop exit
PB: predicated region body
PF: predicated region fallthrough
CT: control target
= control target key end

     0   :  { %9 = vsyncpa [#allocation3], 0  ;;  %s2795_s0 = inlined_call_operand.vmem [shape: bf16[2,10,10,32], index: 0, kind: input, shape index: {}]   ;;  %s2796_s1 = inlined_call_operand.vmem [shape: bf16[9,32,32], index: 1, kind: input, shape index: {}]   ;;  %s2797_s2 = inlined_call_operand.vmem [shape: f32[3,32], index: 2, kind: input, shape index: {}]   ;;  %s2798_s3 = inlined_call_operand.vmem [shape: bf16[2,64,32], index: 3, kind: input, shape index: {}]   ;;  %s2799_s4 = inlined_call_operand.hbm [shape: f32[2,64,32], index: 4, kind: output, shape index: {}]  }
   0x1   :  { %11 = vsyncpa [#allocation3 + $0x1], 0  ;;  %s2276_s15 = smov 0   ;;  %s2278_s16 = smov 0  }
   0x2   :  { %s2280_s17 = smov 0   ;;  %s2282_s18 = smov 0  }
   0x3 LB: > { %s2297_s19 = sadd.s32 4294967295, %s2246_s18   ;;  %s1686_s20 = sadd.s32 4294967294, %s2246_s18   ;;  %s2246_s18 = sphi %s2282_s18, %s2809_s18   ;;  %s2242_s17 = sphi %s2280_s17, %s2808_s17   ;;  %s2238_s16 = sphi %s2278_s16, %s2807_s16   ;;  %s2234_s15 = sphi %s2276_s15, %s2806_s15  }
   0x4   : > { %s2301_s21 = sadd.s32 1, %s2246_s18   ;;  %s118_s22 = sadd.s32 1, %s2242_s17 }
   0x5   : > { %s115_s23 = ssub.s32 %s2246_s18, %s2301_s21  ;;  %p128_p0 = scmp.ne.s32.totalorder %s2242_s17, %s2238_s16 }
   0x6   : > { %p116_p1 = scmp.eq.s32.totalorder %s115_s23, 0  ;;  %p129_p2 = scmp.eq.s32.totalorder %s2297_s19, 1 }
   0x7   : > { %p134_p3 = scmp.ne.s32.totalorder %s2238_s16, %s2234_s15  ;;  %p135_p4 = scmp.eq.s32.totalorder %s1686_s20, 1 }
   0x8   : > { %s2312_s24 = scalar_select %p116_p1, %s2242_s17, %s118_s22  }
   0x9   : > { %p2314_p5 = por %p129_p2, %p128_p0  ;;  %p2318_p6 = por %p135_p4, %p134_p3 }
   0xa   : > { %p1689_p7 = scmp.ge.s32.totalorder %s2246_s18, 1  ;;  %p175_p8 = scmp.lt.s32.totalorder %s2246_s18, 3 }
   0xc   : > { %p176_p9 = pnand %p1689_p7, %p175_p8 }
   0xd   : > { %v2123_v0 = vld [vmem:[%s2796_s1 + $0x30] sm:$0xff] (!%p176_p9)   ;;  %p206_p10 = scmp.lt.s32.totalorder (!%p176_p9), %s2297_s19, 1  ;;  %v2124_v1 = vld [vmem:[%s2796_s1 + $0x38] sm:$0xff] (!%p176_p9)   ;;  %v2337_v2 = vld [vmem:[%s2796_s1 + $0x40] sm:$0xff] (!%p176_p9)   ;;  %vm268_vm0 = vcmask (!%p176_p9), 261120   ;;  %vm1046_vm4 = vcmask (!%p176_p9), 1042432  }
   0xe   : > { %179 = sbr.rel (%p176_p9) target bundleno = 466 (0x1d2), region = 36  ;;  %1905 = vmatprep.subr.bf16.mxu1 (!%p176_p9), %v2123_v0  ;;  %v2342_v3 = vld [vmem:[%s2796_s1 + $0x48] sm:$0xff] (!%p176_p9)   ;;  %1953 = vmatprep.subr.bf16.mxu0 (!%p176_p9), %v2337_v2  ;;  %v2133_v4 = vld [vmem:[%s2796_s1] sm:$0xff] (!%p176_p9)   ;;  %v2359_v5 = vld [vmem:[%s2796_s1 + $0x70] sm:$0xff] (!%p176_p9)   ;;  %vm557_vm1 = vsmask.f32 (!%p176_p9), 3328 }
   0xf   : > { %1906 = vmatpush3.bf16.msra.mxu1 (!%p176_p9), %v2123_v0  ;;  %1954 = vmatpush3.bf16.msra.mxu0 (!%p176_p9), %v2337_v2  ;;  %vm558_vm2 = vsmask.f32 (!%p176_p9), 7440  ;;  %v2135_v40 = vld [vmem:[%s2796_s1 + $0x8] sm:$0xff] (!%p176_p9)   ;;  %v2140_v0 = vld [vmem:[%s2796_s1 + $0x60] sm:$0xff] (!%p176_p9)   ;;  %vm1047_vm5 = vcmask (!%p176_p9), 1046532   ;;  %s1831_s28 = sshll.u32 (!%p176_p9), %s2297_s19, 10 }
  0x10   : > { %1907 = vmatprep.subr.bf16.mxu1 (!%p176_p9), %v2124_v1  ;;  %1955 = vmatprep.subr.bf16.mxu0 (!%p176_p9), %v2342_v3  ;;  %vm2413_vm3 = vmor (!%p176_p9), %vm557_vm1, %vm558_vm2  ;;  %s2248_s9 = smov (!%p176_p9), [#allocation2]  }
  0x11   : > { %vm2534_vm6 = vmor (!%p176_p9), %vm1046_vm4, %vm1047_vm5 }
  0x13   : > { %1908 = vmatpush3.bf16.msra.mxu1 (!%p176_p9), %v2124_v1  ;;  %1956 = vmatpush3.bf16.msra.mxu0 (!%p176_p9), %v2342_v3 }
  0x14   : > { %1917 = vmatprep.subr.bf16.mxu1 (!%p176_p9), %v2133_v4  ;;  %1965 = vmatprep.subr.bf16.mxu0 (!%p176_p9), %v2359_v5 }
  0x15   : > { %s2332_s5 = scalar_select %p206_p10, %s2297_s19, 1 }
  0x16   : > { %s2745_s19 = scalar_lea.hbm %s2799_s4, %s1831_s28 }
  0x17   : > { %s2081_s10 = smul.u32 80, %s2332_s5  ;;  %s1830_s12 = sshll.u32 %s2332_s5, 5 }
  0x18   : > { %s215_s22 = scalar_lea.vmem %s2798_s3, %s1830_s12  ;;  %s203_s5 = sand.u32 1, %s2238_s16  }
  0x19   : > { %s2353_s20 = scalar_lea.vmem %s2795_s0, %s2081_s10  ;;  %s1690_s23 = sshll.u32 %s203_s5, 6 }
  0x1a   : > { %v218_v6 = vld [vmem:[%s2353_s20 + $0x8] sm:$0xf]  ;;  %v219_v7 = vld [vmem:[%s2353_s20 + $0x10] sm:$0xf]  ;;  %v220_v8 = vld [vmem:[%s2353_s20 + $0x18] sm:$0xf] }
  0x1b   : > { %v2365_v9 = vld [vmem:[%s2353_s20 + $0x20] sm:$0xf]  ;;  %v1698_v10 = vcombine.low %v218_v6, %v219_v7  ;;  %v222_v11 = vld [vmem:[%s2353_s20 + $0x28] sm:$0xf]  ;;  %v2371_v13 = vld [vmem:[%s2353_s20 + $0x30] sm:$0xf]  ;;  %v2419_v52 = vcombine.low %v219_v7, %v220_v8 }
  0x1c   : > { %v1699_v12 = vcombine.low %v220_v8, %v2365_v9  ;;  %v1700_v14 = vcombine.low %v222_v11, %v2371_v13  ;;  %v2378_v15 = vld [vmem:[%s2353_s20 + $0x38] sm:$0xf]  ;;  %v2381_v16 = vld [vmem:[%s2353_s20 + $0x40] sm:$0xf]  ;;  %v539_v17 = vld [vmem:[%s2353_s20 + $0x8] sm:$0xf]  ;;  %v2423_v59 = vcombine.low %v2365_v9, %v222_v11 }
  0x1d   : > { %1909 = vmatprep.mubr.msk.bf16.mxu1 %vm268_vm0, %v1698_v10  ;;  %v2386_v18 = vld [vmem:[%s2353_s20 + $0xc] sm:$0x1]  ;;  %v541_v19 = vld [vmem:[%s2353_s20 + $0x10] sm:$0xf]  ;;  %v217_v20 = vld [vmem:[%s2353_s20] sm:$0xf]  ;;  %v1701_v21 = vcombine.low %v2378_v15, %v2381_v16 }
  0x1e   : > { %1910 = vmatmul.mubr.msk.bf16.vlgmr.msra.gmra.mrb[0].mxu1 %vm268_vm0, %v1699_v12  ;;  %v2393_v22 = vld [vmem:[%s2353_s20 + $0x14] sm:$0x1]  ;;  %v543_v23 = vld [vmem:[%s2353_s20 + $0x18] sm:$0xf]  ;;  %v575_v24 = vshrl.u32 %v539_v17, 16  ;;  %v578_v26 = vshll.u32 %v539_v17, 16  ;;  %v1708_v30 = vcombine.low %v217_v20, %v218_v6 }
  0x1f   : > { %1913 = vmatprep.mubr.msk.bf16.mxu1 %vm268_vm0, %v1700_v14  ;;  %1918 = vmatpush3.bf16.msra.mxu1 %v2133_v4  ;;  %v2397_v25 = vld [vmem:[%s2353_s20 + $0x1c] sm:$0x1]  ;;  %v584_v27 = vshll.u32 %v2386_v18, 16  ;;  %v589_v28 = vshrl.u32 %v541_v19, 16  ;;  %v592_v29 = vshll.u32 %v541_v19, 16  ;;  %v598_v37 = vshll.u32 %v2393_v22, 16 }
  0x20   : > { %v545_v31 = vld [vmem:[%s2353_s20 + $0x20] sm:$0xf]  ;;  %v577_v32 = vrot.slane %v575_v24, 4  ;;  %v2402_v33 = vld [vmem:[%s2353_s20 + $0x24] sm:$0x1]  ;;  %v580_v34 = vrot.slane %v578_v26, 5  ;;  %1919 = vmatprep.subr.bf16.mxu1 %v2135_v40 }
  0x21   : > { %v591_v35 = vrot.slane %v589_v28, 4  ;;  %v594_v36 = vrot.slane %v592_v29, 5  ;;  %v603_v38 = vshrl.u32 %v543_v23, 16  ;;  %v606_v39 = vshll.u32 %v543_v23, 16  ;;  %v537_v41 = vld [vmem:[%s2353_s20] sm:$0xf] }
  0x22   : > { %v547_v42 = vld [vmem:[%s2353_s20 + $0x28] sm:$0xf]  ;;  %v581_v43 = vor.u32 %v580_v34, %v577_v32  ;;  %v586_v44 = vrot.slane %v584_v27, 5  ;;  %v617_v46 = vshrl.u32 %v545_v31, 16  ;;  %v600_v48 = vrot.slane %v598_v37, 5  ;;  %s205_s27 = scalar_lea.vmem [#allocation2], %s1690_s23 }
  0x23   : > { %v595_v45 = vor.u32 %v594_v36, %v591_v35  ;;  %v605_v49 = vrot.slane %v603_v38, 4  ;;  %v608_v50 = vrot.slane %v606_v39, 5  ;;  %v612_v51 = vshll.u32 %v2397_v25, 16  ;;  %1920 = vmatpush3.bf16.msra.mxu1 %v2135_v40  ;;  %v2435_v8 = vld [vmem:[%s2353_s20 + $0x2c] sm:$0x1]  ;;  %s1612_s29 = sshll.u32 %s205_s27, 4  ;;  %s2747_s29 = int_to_ptr.vmem [resolvable:$true] %s1612_s29 }
  0x24   : > { %v582_v53 = vrot.slane %v581_v43, 4  ;;  %v619_v55 = vrot.slane %v617_v46, 4  ;;  %v620_v57 = vshll.u32 %v545_v31, 16  ;;  %v626_v58 = vshll.u32 %v2402_v33, 16  ;;  %1929 = vmatprep.subr.bf16.mxu1 %v2140_v0  ;;  %v2141_v14 = vld [vmem:[%s2796_s1 + $0x68] sm:$0xff]   ;;  %s2754_s7 = scalar_lea.sflag [#allocation3], %s203_s5 }
  0x25   : > { %v596_v54 = vrot.slane %v595_v45, 4  ;;  %v609_v56 = vor.u32 %v608_v50, %v605_v49  ;;  %v631_v62 = vshrl.u32 %v547_v42, 16  ;;  %v634_v63 = vshll.u32 %v547_v42, 16  ;;  %v549_v20 = vld [vmem:[%s2353_s20 + $0x30] sm:$0xf]  ;;  %s2184_s8 = scalar_lea.vmem %s2747_s29, 1024 }
  0x26   : > { %1914 = vmatmul.mubr.msk.bf16.gmra.mrb[4].mxu1 %vm268_vm0, %v1701_v21  ;;  %v2427_v60 = vsel %vm2413_vm3, %v582_v53, %v586_v44  ;;  %v561_v1 = vshrl.u32 %v537_v41, 16  ;;  %v614_v6 = vrot.slane %v612_v51, 5  ;;  %v622_v7 = vrot.slane %v620_v57, 5  ;;  %v551_v21 = vld [vmem:[%s2353_s20 + $0x38] sm:$0xf]  ;;  %v2137_v51 = vld [vmem:[%s2796_s1 + $0x20] sm:$0xff]   ;;  %p2185_p11 = scmp.ne.s32.totalorder %s2747_s29, %s2184_s8 }
  0x27   : > { %1921 = vmatprep.mubr.msk.bf16.mxu1 %vm268_vm0, %v1708_v30  ;;  %v601_v61 = vsel %vm2413_vm3, %v596_v54, %v600_v48  ;;  %v610_v4 = vrot.slane %v609_v56, 4  ;;  %v564_v9 = vshll.u32 %v537_v41, 16  ;;  %v633_v10 = vrot.slane %v631_v62, 4  ;;  %v2452_v28 = vld [vmem:[%s2353_s20 + $0x34] sm:$0x1]  ;;  %v2136_v44 = vld [vmem:[%s2796_s1 + $0x78] sm:$0xff]  }
  0x28   : > { %v636_v11 = vrot.slane %v634_v63, 5  ;;  %v1747_v12 = vcombine.low %v2427_v60, %v601_v61  ;;  %v623_v17 = vor.u32 %v622_v7, %v619_v55  ;;  %v628_v19 = vrot.slane %v626_v58, 5  ;;  %v2455_v29 = vld [vmem:[%s2353_s20 + $0x4] sm:$0x1]  ;;  %v2466_v38 = vld [vmem:[%s2353_s20 + $0x3c] sm:$0x1]  ;;  %p2186_p12 = pnand %p2185_p11, %p2314_p5 }
  0x29   : > { %v615_v23 = vsel %vm2413_vm3, %v610_v4, %v614_v6  ;;  %v640_v27 = vshll.u32 %v2435_v8, 16  ;;  %v563_v30 = vrot.slane %v561_v1, 4  ;;  %v566_v31 = vrot.slane %v564_v9, 5  ;;  %v553_v40 = vld [vmem:[%s2353_s20 + $0x40] sm:$0xf]  ;;  %v2472_v41 = vld [vmem:[%s2796_s1 + $0x10] sm:$0xff]  }
  0x2a   : > { %1957 = vmatprep.mubr.msk.bf16.mxu0 %vm268_vm0, %v1747_v12  ;;  %v624_v24 = vrot.slane %v623_v17, 4  ;;  %v637_v26 = vor.u32 %v636_v11, %v633_v10  ;;  %v645_v32 = vshrl.u32 %v549_v20, 16  ;;  %v648_v34 = vshll.u32 %v549_v20, 16  ;;  %v2495_v4 = vld [vmem:[%s2353_s20 + $0x4c] sm:$0x1]  ;;  %p2187_p13 = pneg %p2186_p12  ;;  %s2188_s10 = sshll.u32 %s2248_s9, 4  ;;  %s2189_s10 = int_to_ptr.vmem [resolvable:$false] %s2188_s10 }
  0x2b   : > { %v2459_v36 = vcombine.low %v601_v61, %v615_v23  ;;  %v2463_v37 = vcombine.low %v2371_v13, %v2378_v15  ;;  %v659_v39 = vshrl.u32 %v551_v21, 16  ;;  %v570_v42 = vshll.u32 %v2455_v29, 16  ;;  %v555_v15 = vld [vmem:[%s2353_s20 + $0x48] sm:$0xf]  ;;  %v2490_v61 = vld [vmem:[%s2353_s20 + $0x44] sm:$0x1]  ;;  %p2191_p0 = scmp.lt.s32.totalorder %s2747_s29, %s2189_s10 }
  0x2c   : > { %v629_v35 = vsel %vm2413_vm3, %v624_v24, %v628_v19  ;;  %v647_v45 = vrot.slane %v645_v32, 4  ;;  %v654_v13 = vshll.u32 %v2452_v28, 16  ;;  %v638_v46 = vrot.slane %v637_v26, 4  ;;  %v1017_v32 = vld [vmem:[%s2353_s20 + $0x8] sm:$0xe] }
  0x2d   : > { %v1748_v43 = vcombine.low %v615_v23, %v629_v35  ;;  %v642_v48 = vrot.slane %v640_v27, 5  ;;  %v650_v49 = vrot.slane %v648_v34, 5  ;;  %v661_v50 = vrot.slane %v659_v39, 4 }
  0x2e   : > { %1922 = vmatmul.mubr.msk.bf16.vlgmr.msra.gmra.mrb[0].mxu1 %vm268_vm0, %v2419_v52  ;;  %v662_v53 = vshll.u32 %v551_v21, 16  ;;  %v668_v54 = vshll.u32 %v2466_v38, 16  ;;  %v673_v55 = vshrl.u32 %v553_v40, 16  ;;  %v676_v56 = vshll.u32 %v553_v40, 16 }
  0x2f   : > { %1925 = vmatprep.mubr.msk.bf16.mxu1 %vm268_vm0, %v2423_v59  ;;  %1930 = vmatpush3.bf16.msra.mxu1 %v2140_v0  ;;  %v567_v57 = vor.u32 %v566_v31, %v563_v30  ;;  %v651_v58 = vor.u32 %v650_v49, %v647_v45  ;;  %v687_v62 = vshrl.u32 %v555_v15, 16  ;;  %v690_v63 = vshll.u32 %v555_v15, 16  ;;  %v1016_v31 = vld [vmem:[%s2353_s20] sm:$0xe]  ;;  %v1019_v49 = vld [vmem:[%s2353_s20 + $0x18] sm:$0xe] }
  0x30   : > { %1931 = vmatprep.subr.bf16.mxu1 %v2141_v14  ;;  %1958 = vmatmul.mubr.msk.bf16.vlgmr.msra.gmra.mrb[0].mxu0 %vm268_vm0, %v1748_v43  ;;  %v656_v0 = vrot.slane %v654_v13, 5  ;;  %v664_v1 = vrot.slane %v662_v53, 5  ;;  %v675_v6 = vrot.slane %v673_v55, 4  ;;  %v678_v7 = vrot.slane %v676_v56, 5  ;;  %v1020_v56 = vld [vmem:[%s2353_s20 + $0x20] sm:$0xe] }
  0x31   : > { %1966 = vmatpush3.bf16.msra.mxu0 %v2359_v5  ;;  %1969 = vmatprep.mubr.msk.bf16.mxu0 %vm268_vm0, %v2459_v36  ;;  %v572_v9 = vrot.slane %v570_v42, 5  ;;  %v652_v5 = vrot.slane %v651_v58, 4  ;;  %v689_v10 = vrot.slane %v687_v62, 4  ;;  %v692_v11 = vrot.slane %v690_v63, 5  ;;  %v2146_v42 = vld [vmem:[%s2796_s1 + $0x18] sm:$0xff]  }
  0x32   : > { %1967 = vmatprep.subr.bf16.mxu0 %v2136_v44  ;;  %v665_v12 = vor.u32 %v664_v1, %v661_v50  ;;  %v679_v17 = vor.u32 %v678_v7, %v675_v6  ;;  %v682_v19 = vshll.u32 %v2490_v61, 16  ;;  %v568_v20 = vrot.slane %v567_v57, 4  ;;  %v1021_v57 = vld [vmem:[%s2353_s20 + $0x28] sm:$0xe]  ;;  %v2642_v15 = vld [vmem:[%s2797_s2] sm:$0x7] }
  0x33   : > { %1932 = vmatpush3.bf16.msra.mxu1 %v2141_v14  ;;  %v670_v14 = vrot.slane %v668_v54, 5  ;;  %v2502_v21 = vsel %vm2413_vm3, %v638_v46, %v642_v48  ;;  %v693_v23 = vor.u32 %v692_v11, %v689_v10  ;;  %v696_v24 = vshll.u32 %v2495_v4, 16  ;;  %v226_v46 = vld [vmem:[%s2353_s20 + $0x48] sm:$0xf] }
  0x34   : > { %1941 = vmatprep.subr.bf16.mxu1 %v2472_v41  ;;  %v1051_v26 = vrot.slane %v2455_v29, 5  ;;  %v1055_v27 = vrot.slane %v2386_v18, 5  ;;  %v666_v30 = vrot.slane %v665_v12, 4  ;;  %v2514_v34 = vcombine.low %v629_v35, %v2502_v21  ;;  %v2142_v18 = vld [vmem:[%s2796_s1 + $0x28] sm:$0xff]  }
  0x35   : > { %1968 = vmatpush3.bf16.msra.mxu0 %v2136_v44  ;;  %v680_v29 = vrot.slane %v679_v17, 4  ;;  %v684_v40 = vrot.slane %v682_v19, 5  ;;  %v694_v35 = vrot.slane %v693_v23, 4  ;;  %v698_v44 = vrot.slane %v696_v24, 5 }
  0x36   : > { %1926 = vmatmul.mubr.msk.bf16.gmra.mrb[4].mxu1 %vm268_vm0, %v2463_v37  ;;  %1977 = vmatprep.subr.bf16.mxu0 %v2137_v51  ;;  %v2518_v39 = vsel %vm2413_vm3, %v666_v30, %v670_v14  ;;  %v1768_v45 = vrot.slane %v1016_v31, 9  ;;  %v1769_v13 = vrot.slane %v1017_v32, 9  ;;  %v573_v48 = vsel %vm2413_vm3, %v568_v20, %v572_v9  ;;  %v1022_v9 = vld [vmem:[%s2353_s20 + $0x30] sm:$0xe]  ;;  %v2147_v20 = vld [vmem:[%s2796_s1 + $0x58] sm:$0xff]   ;;  %v2149_v31 = vld [vmem:[%s2796_s1 + $0x88] sm:$0xff]  }
  0x37   : > { %1933 = vmatprep.mubr.msk.bf16.mxu1 %vm268_vm0, %v2419_v52  ;;  %v2509_v52 = vsel %vm2413_vm3, %v652_v5, %v656_v0  ;;  %v1722_v54 = vcombine.low %v2381_v16, %v226_v46  ;;  %v1733_v55 = vcombine.low %v573_v48, %v2427_v60  ;;  %v1059_v62 = vrot.slane %v2393_v22, 5 }
  0x38   : > { %v2528_v43 = vcombine.low %v2509_v52, %v2518_v39  ;;  %v1052_v50 = vsel %vm2534_vm6, %v1768_v45, %v1051_v26  ;;  %v1056_v53 = vsel %vm2534_vm6, %v1769_v13, %v1055_v27  ;;  %v1771_v63 = vrot.slane %v1019_v49, 9  ;;  %v1024_v26 = vld [vmem:[%s2353_s20 + $0x40] sm:$0xe] }
  0x39   : > { %v1063_v0 = vrot.slane %v2397_v25, 5  ;;  %v1782_v1 = vcombine.low %v1052_v50, %v1056_v53  ;;  %v1772_v16 = vrot.slane %v1020_v56, 9  ;;  %v1067_v60 = vrot.slane %v2402_v33, 5 }
  0x3a   : > { %v1773_v6 = vrot.slane %v1021_v57, 9  ;;  %v1071_v7 = vrot.slane %v2435_v8, 5  ;;  %v1023_v8 = vld [vmem:[%s2353_s20 + $0x38] sm:$0xe]  ;;  %v1774_v11 = vrot.slane %v1022_v9, 9  ;;  %v1075_v14 = vrot.slane %v2452_v28, 5 }
  0x3b   : > { %v1064_v25 = vsel %vm2534_vm6, %v1771_v63, %v1063_v0  ;;  %v1068_v5 = vsel %vm2534_vm6, %v1772_v16, %v1067_v60  ;;  %v1775_v17 = vrot.slane %v1023_v8, 9  ;;  %v1079_v19 = vrot.slane %v2466_v38, 5 }
  0x3c   : > { %1970 = vmatmul.mubr.msk.bf16.vlgmr.msra.gmra.mrb[0].mxu0 %vm268_vm0, %v2514_v34  ;;  %v1072_v33 = vsel %vm2534_vm6, %v1773_v6, %v1071_v7  ;;  %v1076_v28 = vsel %vm2534_vm6, %v1774_v11, %v1075_v14  ;;  %v1797_v27 = vcombine.low %v1064_v25, %v1068_v5  ;;  %v1776_v30 = vrot.slane %v1024_v26, 9 }
  0x3d   : > { %1978 = vmatpush3.bf16.msra.mxu0 %v2137_v51  ;;  %1973 = vmatprep.mubr.msk.bf16.mxu0 %vm268_vm0, %v2528_v43  ;;  %v2143_v51 = vld [vmem:[%s2796_s1 + $0x50] sm:$0xff]   ;;  %v1784_v12 = vcombine.low %v1068_v5, %v1072_v33  ;;  %v1080_v38 = vsel %vm2534_vm6, %v1775_v17, %v1079_v19  ;;  %v1406_v46 = vlaneseq }
  0x3e   : > { %1934 = vmatmul.mubr.msk.bf16.vlgmr.msra.gmra.mrb[0].mxu1 %vm268_vm0, %v2423_v59  ;;  %v1018_v59 = vld [vmem:[%s2353_s20 + $0x10] sm:$0xe]  ;;  %1979 = vmatprep.subr.bf16.mxu0 %v2142_v18  ;;  %v1785_v23 = vcombine.low %v1076_v28, %v1080_v38 }
  0x3f   : > { %1937 = vmatprep.mubr.msk.bf16.mxu1 %vm268_vm0, %v2463_v37  ;;  %1942 = vmatpush3.bf16.msra.mxu1 %v2472_v41  ;;  %v2551_v37 = vsel %vm2413_vm3, %v680_v29, %v684_v40  ;;  %v699_v41 = vsel %vm2413_vm3, %v694_v35, %v698_v44  ;;  %v1770_v47 = vrot.slane %v1018_v59, 9 }
  0x40   : > { %1943 = vmatprep.subr.bf16.mxu1 %v2146_v42  ;;  %v1761_v58 = vcombine.low %v2551_v37, %v699_v41 }
  0x41   : > { %1980 = vmatpush3.bf16.msra.mxu0 %v2142_v18  ;;  %v1060_v22 = vsel %vm2534_vm6, %v1770_v47, %v1059_v62  ;;  %v1087_v18 = vrot.slane %v2495_v4, 5  ;;  %v2636_v4 = vshrl.u32 %v1406_v46, 7 }
  0x42   : > { %1989 = vmatprep.subr.bf16.mxu0 %v2143_v51  ;;  %v1783_v10 = vcombine.low %v1060_v22, %v1064_v25  ;;  %v1796_v24 = vcombine.low %v1056_v53, %v1060_v22 }
  0x43   : > { %1944 = vmatpush3.bf16.msra.mxu1 %v2146_v42 }
  0x44   : > { %2013 = vmatprep.subr.bf16.mxu1 %v2337_v2  ;;  %1974 = vmatmul.mubr.msk.bf16.gmra.mrb[4].mxu0 %vm268_vm0, %v1761_v58 }
  0x45   : > { %1981 = vmatprep.mubr.msk.bf16.mxu0 %vm268_vm0, %v1782_v1 }
  0x46   : > { %1938 = vmatmul.mubr.msk.bf16.gmra.mrb[4].mxu1 %vm268_vm0, %v1722_v54 }
  0x47   : > { %1945 = vmatprep.mubr.msk.bf16.mxu1 %vm268_vm0, %v1733_v55 }
  0x4c   : > { %1982 = vmatmul.mubr.msk.bf16.vlgmr.msra.gmra.mrb[0].mxu0 %vm268_vm0, %v1783_v10 }
  0x4d   : > { %1990 = vmatpush3.bf16.msra.mxu0 %v2143_v51  ;;  %1985 = vmatprep.mubr.msk.bf16.mxu0 %vm268_vm0, %v1784_v12 }
  0x4e   : > { %1946 = vmatmul.mubr.msk.bf16.vlgmr.msra.gmra.mrb[0].mxu1 %vm268_vm0, %v2459_v36  ;;  %1991 = vmatprep.subr.bf16.mxu0 %v2147_v20  ;;  %v2148_v36 = vld [vmem:[%s2796_s1 + $0x80] sm:$0xff]  }
  0x4f   : > { %1949 = vmatprep.mubr.msk.bf16.mxu1 %vm268_vm0, %v2514_v34  ;;  %2015 = vmatpush3.bf16.msra.mxu1 %v2337_v2  ;;  %v1749_v2 = vcombine.low %v2502_v21, %v2509_v52  ;;  %v1083_v21 = vrot.slane %v2490_v61, 5  ;;  %v1750_v52 = vcombine.low %v2518_v39, %v2551_v37  ;;  %v1025_v61 = vld [vmem:[%s2353_s20 + $0x48] sm:$0xe]  ;;  %v1408_v37 = vsub.s32 0, %v2636_v4  ;;  %s2190_s20 = scalar_lea.vmem %s2189_s10, 2048 }
  0x50   : > { %2014 = vmatprep.subr.bf16.mxu1 %v2342_v3  ;;  %v1777_v39 = vrot.slane %v1025_v61, 9  ;;  %p2192_p1 = scmp.lt.s32.totalorder %s2190_s20, %s2184_s8 }
  0x51   : > { %1992 = vmatpush3.bf16.msra.mxu0 %v2147_v20  ;;  %v1084_v32 = vsel %vm2534_vm6, %v1776_v30, %v1083_v21  ;;  %v1409_v49 = vrot.slane %v2642_v15, %v1408_v37 }
  0x52   : > { %2001 = vmatprep.subr.bf16.mxu0 %v2148_v36  ;;  %v1799_v34 = vcombine.low %v1080_v38, %v1084_v32  ;;  %v1088_v29 = vsel %vm2534_vm6, %v1777_v39, %v1087_v18  ;;  %p2193_p2 = por %p2192_p1, %p2191_p0 }
  0x53   : > { %2016 = vmatpush3.bf16.msra.mxu1 %v2342_v3  ;;  %v1798_v3 = vcombine.low %v1072_v33, %v1076_v28  ;;  %v1810_v40 = vcombine.low %v1084_v32, %v1088_v29 }
  0x54   : > { %1986 = vmatmul.mubr.msk.bf16.gmra.mrb[4].mxu0 %vm268_vm0, %v1785_v23  ;;  %p2194_p3 = pnand %p2193_p2, %p2187_p13 }
  0x55   : > { %1993 = vmatprep.mubr.msk.bf16.mxu0 %vm268_vm0, %v1796_v24 }
  0x56   : > { %1950 = vmatmul.mubr.msk.bf16.gmra.mrb[4].mxu1 %vm268_vm0, %v2528_v43 }
  0x57   : > { %1961 = vmatprep.mubr.msk.bf16.mxu1 %vm268_vm0, %v1749_v2 }
  0x5c   : > { %1994 = vmatmul.mubr.msk.bf16.vlgmr.msra.gmra.mrb[0].mxu0 %vm268_vm0, %v1797_v27 }
  0x5d   : > { %2002 = vmatpush3.bf16.msra.mxu0 %v2148_v36  ;;  %1997 = vmatprep.mubr.msk.bf16.mxu0 %vm268_vm0, %v1798_v3 }
  0x5e   : > { %2003 = vmatprep.subr.bf16.mxu0 %v2149_v31 }
  0x61   : > { %2004 = vmatpush3.bf16.msra.mxu0 %v2149_v31 }
  0x62   : > { %1962 = vmatmul.mubr.msk.bf16.vlgmr.msra.gmra.mrb[4].mxu1 %vm268_vm0, %v1750_v52 }
  0x64   : > { %1998 = vmatmul.mubr.msk.bf16.gmra.mrb[4].mxu0 %vm268_vm0, %v1799_v34 }
  0x65   : > { %2005 = vmatprep.mubr.msk.bf16.mxu0 %vm268_vm0, %v1783_v10 }
  0x6c   : > { %2006 = vmatmul.mubr.msk.bf16.vlgmr.msra.gmra.mrb[0].mxu0 %vm268_vm0, %v1784_v12 }
  0x6d   : > { %2009 = vmatprep.mubr.msk.bf16.mxu0 %vm268_vm0, %v1785_v23 }
  0x74   : > { %2010 = vmatmul.mubr.msk.bf16.gmra.mrb[4].mxu0 %vm268_vm0, %v1810_v40 }
 0x121   : > { %v1947_v42 = vpop.f32.mrb[0].mxu1 }
 0x122   : > { %v775_v43 = vpop.f32.mrb[1].mxu1 }
 0x123   : > { %v1948_v35 = vpop.f32.mrb[2].mxu1 }
 0x124   : > { %v778_v44 = vpop.f32.mrb[3].mxu1 }
 0x135   : > { %v1963_v45 = vpop.f32.mrb[4].mxu1 }
 0x136   : > { %v898_v13 = vpop.f32.mrb[5].mxu1 }
 0x137   : > { %v1964_v48 = vpop.f32.mrb[6].mxu1 }
 0x138   : > { %v901_v59 = vpop.f32.mrb[7].mxu1 }
 0x13f   : > { %v2007_v41 = vpop.f32.mrb[0].mxu0 }
 0x140   : > { %v2017_v50 = vadd.f32 %v2007_v41, %v1947_v42  ;;  %v1366_v53 = vpop.f32.mrb[1].mxu0 }
 0x141   : > { %v2018_v51 = vadd.f32 %v1366_v53, %v775_v43  ;;  %v2008_v54 = vpop.f32.mrb[2].mxu0 }
 0x142   : > { %v2019_v55 = vadd.f32 %v2008_v54, %v1948_v35  ;;  %v1369_v56 = vpop.f32.mrb[3].mxu0  ;;  %v2647_v58 = vadd.f32 %v2017_v50, %v1409_v49 }
 0x143   : > { %v2645_v57 = vadd.f32 %v2018_v51, %v1409_v49  ;;  %v2020_v47 = vadd.f32 %v1369_v56, %v778_v44 }
 0x144   : > { %v2653_v0 = vadd.f32 %v2019_v55, %v1409_v49  ;;  %v1421_v22 = vsel %vm268_vm0, %v2647_v58, 0.0 }
 0x145   : > { %v2649_v62 = vadd.f32 %v2020_v47, %v1409_v49  ;;  %v1418_v63 = vsel %vm268_vm0, %v2645_v57, 0.0 }
 0x146   : > { %v1423_v10 = vsel %vm268_vm0, %v2653_v0, 0.0 }
 0x147   : > { %v1419_v1 = vsel %vm268_vm0, %v2649_v62, 0.0  ;;  %v2011_v16 = vpop.f32.mrb[4].mxu0 }
 0x148   : > { %v1420_v60 = vadd.f32 %v1419_v1, %v1418_v63  ;;  %v2021_v6 = vadd.f32 %v2011_v16, %v1963_v45  ;;  %v1382_v7 = vpop.f32.mrb[5].mxu0 }
 0x149   : > { %v2022_v25 = vadd.f32 %v1382_v7, %v898_v13  ;;  %v2012_v9 = vpop.f32.mrb[6].mxu0 }
 0x14a   : > { %v1422_v5 = vadd.f32 %v1421_v22, %v1420_v60  ;;  %v2023_v33 = vadd.f32 %v2012_v9, %v1964_v48  ;;  %v1385_v8 = vpop.f32.mrb[7].mxu0  ;;  %v2663_v17 = vadd.f32 %v2021_v6, %v1409_v49 }
 0x14b   : > { %v2661_v11 = vadd.f32 %v2022_v25, %v1409_v49  ;;  %v2024_v12 = vadd.f32 %v1385_v8, %v901_v59 }
 0x14c   : > { %v1424_v14 = vadd.f32 %v1423_v10, %v1422_v5  ;;  %v2669_v38 = vadd.f32 %v2023_v33, %v1409_v49  ;;  %v1429_v23 = vsel %vm268_vm0, %v2663_v17, 0.0 }
 0x14d   : > { %v1425_v19 = vsel %vm268_vm0, %v2661_v11, 0.0  ;;  %v2667_v20 = vadd.f32 %v2024_v12, %v1409_v49 }
 0x14e   : > { %v1426_v28 = vadd.f32 %v1425_v19, %v1424_v14  ;;  %v1431_v26 = vsel %vm268_vm0, %v2669_v38, 0.0 }
 0x14f   : > { %v1427_v36 = vsel %vm268_vm0, %v2667_v20, 0.0 }
 0x150   : > { %v1428_v2 = vadd.f32 %v1427_v36, %v1426_v28  ;;  %v1488_v28 = vsub.s32 1, %v2636_v4 }
 0x152   : > { %v1430_v24 = vadd.f32 %v1429_v23, %v1428_v2 }
 0x154   : > { %v1432_v27 = vadd.f32 %v1431_v26, %v1430_v24  ;;  %v1500_v26 = vsub.s32 2, %v2636_v4 }
 0x156   : > { %v1433_v3 = vrot.slane %v1432_v27, 4 }
 0x158   : > { %v1434_v30 = vadd.f32 %v1433_v3, %v1432_v27 }
 0x15a   : > { %v1435_v21 = vrot.slane %v1434_v30, 2 }
 0x15c   : > { %v1436_v52 = vadd.f32 %v1435_v21, %v1434_v30 }
 0x15e   : > { %v1437_v31 = vrot.slane %v1436_v52, 1 }
 0x160   : > { %v1438_v32 = vadd.f32 %v1437_v31, %v1436_v52 }
 0x162   : > { %v1439_v34 = vmul.f32 0.015625, %v1438_v32 }
 0x164   : > { %v1440_v61 = vsub.f32 %v2645_v57, %v1439_v34  ;;  %v1441_v39 = vsub.f32 %v2649_v62, %v1439_v34  ;;  %v1442_v18 = vsub.f32 %v2647_v58, %v1439_v34  ;;  %v1443_v29 = vsub.f32 %v2653_v0, %v1439_v34 }
 0x165   : > { %v1444_v40 = vsub.f32 %v2661_v11, %v1439_v34  ;;  %v1445_v44 = vsub.f32 %v2667_v20, %v1439_v34  ;;  %v1446_v59 = vsub.f32 %v2663_v17, %v1439_v34  ;;  %v1447_v50 = vsub.f32 %v2669_v38, %v1439_v34 }
 0x166   : > { %v1448_v42 = vmul.f32 %v1440_v61, %v1440_v61  ;;  %v1449_v43 = vmul.f32 %v1441_v39, %v1441_v39  ;;  %v1450_v35 = vmul.f32 %v1442_v18, %v1442_v18  ;;  %v1451_v45 = vmul.f32 %v1443_v29, %v1443_v29 }
 0x167   : > { %v1452_v37 = vmul.f32 %v1444_v40, %v1444_v40  ;;  %v1453_v53 = vmul.f32 %v1445_v44, %v1445_v44  ;;  %v1454_v55 = vmul.f32 %v1446_v59, %v1446_v59  ;;  %v1455_v63 = vmul.f32 %v1447_v50, %v1447_v50 }
 0x168   : > { %v1456_v13 = vsel %vm268_vm0, %v1448_v42, 0.0  ;;  %v1457_v46 = vsel %vm268_vm0, %v1449_v43, 0.0  ;;  %v1459_v41 = vsel %vm268_vm0, %v1450_v35, 0.0  ;;  %v1461_v51 = vsel %vm268_vm0, %v1451_v45, 0.0 }
 0x169   : > { %v1458_v48 = vadd.f32 %v1457_v46, %v1456_v13  ;;  %v1463_v56 = vsel %vm268_vm0, %v1452_v37, 0.0  ;;  %v1465_v1 = vsel %vm268_vm0, %v1453_v53, 0.0  ;;  %v1467_v60 = vsel %vm268_vm0, %v1454_v55, 0.0 }
 0x16a   : > { %v1469_v7 = vsel %vm268_vm0, %v1455_v63, 0.0  ;;  %v1833_v63 = vld [vmem:[%s215_s22] sm:$0xff]  }
 0x16b   : > { %v1460_v49 = vadd.f32 %v1459_v41, %v1458_v48 }
 0x16d   : > { %v1462_v54 = vadd.f32 %v1461_v51, %v1460_v49 }
 0x16f   : > { %v1464_v47 = vadd.f32 %v1463_v56, %v1462_v54 }
 0x171   : > { %v1466_v16 = vadd.f32 %v1465_v1, %v1464_v47  ;;  %v1848_v1 = vld [vmem:[%s215_s22 + $0x8] sm:$0xff]  }
 0x173   : > { %v1468_v6 = vadd.f32 %v1467_v60, %v1466_v16  ;;  %v1834_v16 = vunpack.c.l.bf16 %v1833_v63 }
 0x175   : > { %v1470_v22 = vadd.f32 %v1469_v7, %v1468_v6  ;;  %v1835_v6 = vunpack.c.h.bf16 %v1833_v63  ;;  %v1849_v7 = vld [vmem:[%s215_s22 + $0x10] sm:$0xff]  }
 0x177   : > { %v1471_v25 = vrot.slane %v1470_v22, 4 }
 0x179   : > { %v1472_v9 = vadd.f32 %v1471_v25, %v1470_v22 }
 0x17b   : > { %v1473_v5 = vrot.slane %v1472_v9, 2 }
 0x17d   : > { %v1474_v33 = vadd.f32 %v1473_v5, %v1472_v9  ;;  %v1838_v9 = vunpack.c.l.bf16 %v1848_v1 }
 0x17f   : > { %v1475_v8 = vrot.slane %v1474_v33, 1 }
 0x181   : > { %v1476_v10 = vadd.f32 %v1475_v8, %v1474_v33  ;;  %v1839_v8 = vunpack.c.h.bf16 %v1848_v1 }
 0x183   : > { %v1477_v12 = vmul.f32 0.015625, %v1476_v10  ;;  %v1850_v10 = vld [vmem:[%s215_s22 + $0x18] sm:$0xff]  }
 0x185   : > { %v1478_v14 = vadd.f32 1e-05, %v1477_v12 }
 0x187   : > { %2150 = vrsqrt.f32 %v1478_v14 }
 0x191   : > { %v2151_v19 = vpop.eup %2150 }
 0x192   : > { %v1480_v36 = vmul.f32 %v2151_v19, %v2642_v15  ;;  %v1842_v19 = vunpack.c.l.bf16 %v1849_v7 }
 0x194   : > { %v1481_v2 = vmul.f32 %v1480_v36, %v1439_v34  ;;  %v1489_v23 = vrot.slane %v1480_v36, %v1488_v28 }
 0x196   : > { %v1483_v24 = vrot.slane %v1481_v2, 7  ;;  %v1490_v3 = vmul.f32 %v1489_v23, %v2645_v57  ;;  %v1491_v30 = vmul.f32 %v1489_v23, %v2649_v62  ;;  %v1492_v21 = vmul.f32 %v1489_v23, %v2647_v58 }
 0x197   : > { %v1493_v52 = vmul.f32 %v1489_v23, %v2653_v0  ;;  %v1494_v32 = vmul.f32 %v1489_v23, %v2661_v11  ;;  %v1495_v61 = vmul.f32 %v1489_v23, %v2667_v20  ;;  %v1496_v34 = vmul.f32 %v1489_v23, %v2663_v17 }
 0x198   : > { %v1485_v27 = vsub.f32 %v2642_v15, %v1483_v24  ;;  %v1497_v57 = vmul.f32 %v1489_v23, %v2669_v38  ;;  %v1843_v23 = vunpack.c.h.bf16 %v1849_v7 }
 0x19a   : > { %v1501_v31 = vrot.slane %v1485_v27, %v1500_v26 }
 0x19c   : > { %v1502_v39 = vadd.f32 %v1501_v31, %v1490_v3  ;;  %v1503_v18 = vadd.f32 %v1501_v31, %v1491_v30  ;;  %v2704_v4 = vadd.f32 %v1501_v31, %v1492_v21  ;;  %v2706_v15 = vadd.f32 %v1501_v31, %v1493_v52 }
 0x19d   : > { %v2709_v62 = vadd.f32 %v1501_v31, %v1494_v32  ;;  %v2711_v58 = vadd.f32 %v1501_v31, %v1495_v61  ;;  %v2713_v0 = vadd.f32 %v1501_v31, %v1496_v34  ;;  %v2716_v40 = vadd.f32 %v1501_v31, %v1497_v57 }
 0x19e   : > { %v1817_v29 = vmul.f32 -1.442695, %v1502_v39  ;;  %v1818_v11 = vmul.f32 -1.442695, %v1503_v18  ;;  %v1819_v20 = vmul.f32 -1.442695, %v2704_v4  ;;  %v1846_v3 = vunpack.c.l.bf16 %v1850_v10 }
 0x19f   : > { %v1820_v17 = vmul.f32 -1.442695, %v2706_v15  ;;  %v1821_v42 = vmul.f32 -1.442695, %v2709_v62  ;;  %v1822_v38 = vmul.f32 -1.442695, %v2711_v58  ;;  %v1847_v31 = vunpack.c.h.bf16 %v1850_v10 }
 0x1a0   : > { %2152 = vpow2.f32 %v1817_v29  ;;  %v1823_v43 = vmul.f32 -1.442695, %v2713_v0  ;;  %v1824_v35 = vmul.f32 -1.442695, %v2716_v40 }
 0x1a1   : > { %2154 = vpow2.f32 %v1818_v11 }
 0x1a2   : > { %2156 = vpow2.f32 %v1819_v20 }
 0x1a3   : > { %2158 = vpow2.f32 %v1820_v17 }
 0x1a4   : > { %2160 = vpow2.f32 %v1821_v42 }
 0x1a5   : > { %2162 = vpow2.f32 %v1822_v38 }
 0x1a6   : > { %2164 = vpow2.f32 %v1823_v43 }
 0x1a7   : > { %2166 = vpow2.f32 %v1824_v35 }
 0x1aa   : > { %v2153_v44 = vpop.eup %2152 }
 0x1ab   : > { %v2155_v45 = vpop.eup %2154  ;;  %v1534_v13 = vadd.f32 1.0, %v2153_v44 }
 0x1ac   : > { %v2157_v46 = vpop.eup %2156  ;;  %v1535_v48 = vadd.f32 1.0, %v2155_v45 }
 0x1ad   : > { %v2159_v59 = vpop.eup %2158  ;;  %v1536_v37 = vadd.f32 1.0, %v2157_v46  ;;  %2168 = vrcp.f32 %v1534_v13 }
 0x1ae   : > { %v2161_v41 = vpop.eup %2160  ;;  %v1537_v49 = vadd.f32 1.0, %v2159_v59  ;;  %2170 = vrcp.f32 %v1535_v48 }
 0x1af   : > { %v2163_v50 = vpop.eup %2162  ;;  %v1538_v53 = vadd.f32 1.0, %v2161_v41  ;;  %2172 = vrcp.f32 %v1536_v37 }
 0x1b0   : > { %v2165_v51 = vpop.eup %2164  ;;  %v1539_v54 = vadd.f32 1.0, %v2163_v50  ;;  %2174 = vrcp.f32 %v1537_v49 }
 0x1b1   : > { %v2167_v55 = vpop.eup %2166  ;;  %v1540_v56 = vadd.f32 1.0, %v2165_v51  ;;  %2176 = vrcp.f32 %v1538_v53 }
 0x1b2   : > { %v1541_v47 = vadd.f32 1.0, %v2167_v55  ;;  %2178 = vrcp.f32 %v1539_v54 }
 0x1b3   : > { %2180 = vrcp.f32 %v1540_v56 }
 0x1b4   : > { %2182 = vrcp.f32 %v1541_v47 }
 0x1b7   : > { %v2169_v60 = vpop.eup %2168 }
 0x1b8   : > { %v2171_v22 = vpop.eup %2170  ;;  %v1558_v25 = vmul.f32 %v2169_v60, %v1502_v39 }
 0x1b9   : > { %v2173_v5 = vpop.eup %2172  ;;  %v1559_v33 = vmul.f32 %v2171_v22, %v1503_v18 }
 0x1ba   : > { %v2175_v12 = vpop.eup %2174  ;;  %v1560_v14 = vmul.f32 %v2173_v5, %v2704_v4  ;;  %v1582_v28 = vadd.f32 %v1834_v16, %v1558_v25 }
 0x1bb   : > { %v2177_v36 = vpop.eup %2176  ;;  %v1561_v2 = vmul.f32 %v2175_v12, %v2706_v15  ;;  %v1583_v24 = vadd.f32 %v1835_v6, %v1559_v33 }
 0x1bc   : > { %v2179_v26 = vpop.eup %2178  ;;  %v1562_v27 = vmul.f32 %v2177_v36, %v2709_v62  ;;  %v1584_v30 = vadd.f32 %v1838_v9, %v1560_v14  ;;  %1590 = vst.msk [vmem:[%s205_s27] sm:$0xff] %vm268_vm0, %v1582_v28 }
 0x1bd   : > { %v2181_v21 = vpop.eup %2180  ;;  %v1563_v52 = vmul.f32 %v2179_v26, %v2711_v58  ;;  %v1585_v32 = vadd.f32 %v1839_v8, %v1561_v2  ;;  %1591 = vst.msk [vmem:[%s205_s27 + $0x8] sm:$0xff] %vm268_vm0, %v1583_v24 }
 0x1be   : > { %v2183_v61 = vpop.eup %2182  ;;  %v1564_v34 = vmul.f32 %v2181_v21, %v2713_v0  ;;  %v1586_v39 = vadd.f32 %v1842_v19, %v1562_v27  ;;  %1592 = vst.msk [vmem:[%s205_s27 + $0x10] sm:$0xff] %vm268_vm0, %v1584_v30 }
 0x1bf   : > { %v1565_v18 = vmul.f32 %v2183_v61, %v2716_v40  ;;  %v1587_v4 = vadd.f32 %v1843_v23, %v1563_v52  ;;  %1593 = vst.msk [vmem:[%s205_s27 + $0x18] sm:$0xff] %vm268_vm0, %v1585_v32 }
 0x1c0   : > { %v1588_v15 = vadd.f32 %v1846_v3, %v1564_v34  ;;  %1594 = vst.msk [vmem:[%s205_s27 + $0x20] sm:$0xff] %vm268_vm0, %v1586_v39 }
 0x1c1   : > { %v1589_v57 = vadd.f32 %v1847_v31, %v1565_v18  ;;  %1595 = vst.msk [vmem:[%s205_s27 + $0x28] sm:$0xff] %vm268_vm0, %v1587_v4 }
 0x1c2   : > { %1596 = vst.msk [vmem:[%s205_s27 + $0x30] sm:$0xff] %vm268_vm0, %v1588_v15 }
 0x1c3   : > { %1597 = vst.msk [vmem:[%s205_s27 + $0x38] sm:$0xff] %vm268_vm0, %v1589_v57 }
 0x1c4   : > { %2197 = shalt.err (!%p2194_p3)
}
 0x1c5   : > { %s2198_s11 = scalar_lea.hbm %s2745_s19, 1024  ;;  %s2202_s14 = scalar_lea.hbm %s2799_s4, 2048 }
 0x1c6   : > { %p2199_p4 = scmp.ne.s32.totalorder %s2745_s19, %s2198_s11  ;;  %p2203_p9 = scmp.lt.u32.totalorder %s2745_s19, %s2799_s4 }
 0x1c7   : > { %p2204_p10 = scmp.lt.u32.totalorder %s2202_s14, %s2198_s11  ;;  %p2206_p12 = scmp.lt.u32.totalorder %s2198_s11, %s2745_s19 }
 0x1c8   : > { %p2200_p7 = pnand %p2199_p4, %p2314_p5 }
 0x1c9   : > { %p2205_p11 = por %p2204_p10, %p2203_p9 }
 0x1ca   : > { %p2201_p8 = pneg %p2200_p7 }
 0x1cb   : > { %p2207_p13 = por %p2206_p12, %p2205_p11 }
 0x1cd   : > { %p2208_p0 = pnand %p2207_p13, %p2201_p8 }
 0x1cf   : > { %2211 = shalt.err (!%p2208_p0)
}
 0x1d0   : > { %s2249_s23 = smov 128   ;;  %s2250_s27 = smov 8  }
 0x1d1   : > { %2082 = dma.vmem_to_hbm [thread:$0]  (%p2314_p5), %s2747_s29, 1024, %s2745_s19, %s2754_s7, %s2249_s23, %s2249_s23, %s2250_s27  }
 0x1d2 PF: > { %p2088_p1 = scmp.ge.s32.totalorder %s2246_s18, 2  ;;  %s1627_s28 = sand.u32 1, %s2234_s15  }
 0x1d3   : > { %s1628_s30 = scalar_lea.sflag [#allocation3], %s1627_s28 }
 0x1d4   : > { %p2085_p2 = pnand %p2088_p1, %p2318_p6 }
 0x1d6   : > { %2229 = dma.done.wait (!%p2085_p2), %s1628_s30, 1024  }
 0x1d7   : > { %2231 = vsyncadd (!%p2085_p2), %s1628_s30, 4294966272  ;;  %p14_p3 = scmp.ge.s32.totalorder %s2301_s21, 4   ;;  %s2806_s15 = smov %s2238_s16 }
 0x1d8   : > { %s2807_s16 = smov %s2242_s17  ;;  %s2808_s17 = smov %s2312_s24 }
 0x1d9   : > { %s2809_s18 = smov %s2301_s21  ;;  %16 = sbr.rel (!%p14_p3) target bundleno = 3 (0x3), region = 82 }
 0x1e0   :  { %1633 = vsyncpa [#allocation3], 1 }
 0x1e1   :  { %1635 = vsyncpa [#allocation3 + $0x1], 1 }

// kernel: down_block_forward.4
= control target key start
LH: loop header
LB: loop body
LE: loop exit
PB: predicated region body
PF: predicated region fallthrough
CT: control target
= control target key end

     0   :  { %s2103_s12 = smov 0   ;;  %s2513_s0 = inlined_call_operand.vmem [shape: bf16[2,10,10,32], index: 0, kind: input, shape index: {}]   ;;  %s2514_s1 = inlined_call_operand.vmem [shape: bf16[9,32,32], index: 1, kind: input, shape index: {}]   ;;  %s2515_s2 = inlined_call_operand.vmem [shape: f32[3,32], index: 2, kind: input, shape index: {}]   ;;  %s2516_s3 = inlined_call_operand.vmem [shape: bf16[2,64,32], index: 3, kind: output, shape index: {}]  }
   0x1 LB: > { %s1617_s13 = sadd.s32 4294967295, %s2081_s12   ;;  %p1621_p0 = scmp.ge.s32.totalorder %s2081_s12, 1  ;;  %s2081_s12 = sphi %s2103_s12, %s13_s12  }
   0x2   : > { %p137_p1 = scmp.lt.s32.totalorder %s2081_s12, 3 }
   0x4   : > { %p138_p2 = pnand %p1621_p0, %p137_p1 }
   0x5   : > { %v2014_v0 = vld [vmem:[%s2514_s1 + $0x30] sm:$0xff] (!%p138_p2)   ;;  %p161_p3 = scmp.lt.s32.totalorder (!%p138_p2), %s1617_s13, 1  ;;  %v2015_v1 = vld [vmem:[%s2514_s1 + $0x38] sm:$0xff] (!%p138_p2)   ;;  %v2122_v2 = vld [vmem:[%s2514_s1 + $0x40] sm:$0xff] (!%p138_p2)   ;;  %vm223_vm0 = vcmask (!%p138_p2), 261120   ;;  %vm1001_vm4 = vcmask (!%p138_p2), 1042432  }
   0x6   : > { %141 = sbr.rel (%p138_p2) target bundleno = 443 (0x1bb), region = 32  ;;  %1829 = vmatprep.subr.bf16.mxu1 (!%p138_p2), %v2014_v0  ;;  %v2127_v3 = vld [vmem:[%s2514_s1 + $0x48] sm:$0xff] (!%p138_p2)   ;;  %1877 = vmatprep.subr.bf16.mxu0 (!%p138_p2), %v2122_v2  ;;  %v2024_v4 = vld [vmem:[%s2514_s1] sm:$0xff] (!%p138_p2)   ;;  %v2144_v5 = vld [vmem:[%s2514_s1 + $0x70] sm:$0xff] (!%p138_p2)   ;;  %vm512_vm1 = vsmask.f32 (!%p138_p2), 3328 }
   0x7   : > { %1830 = vmatpush3.bf16.msra.mxu1 (!%p138_p2), %v2014_v0  ;;  %1878 = vmatpush3.bf16.msra.mxu0 (!%p138_p2), %v2122_v2  ;;  %vm513_vm2 = vsmask.f32 (!%p138_p2), 7440  ;;  %v2026_v40 = vld [vmem:[%s2514_s1 + $0x8] sm:$0xff] (!%p138_p2)   ;;  %v2031_v0 = vld [vmem:[%s2514_s1 + $0x60] sm:$0xff] (!%p138_p2)   ;;  %vm1002_vm5 = vcmask (!%p138_p2), 1046532   ;;  %vm1553_vm7 = vcmask (!%p138_p2), 257024  }
   0x8   : > { %1831 = vmatprep.subr.bf16.mxu1 (!%p138_p2), %v2015_v1  ;;  %1879 = vmatprep.subr.bf16.mxu0 (!%p138_p2), %v2127_v3  ;;  %vm2198_vm3 = vmor (!%p138_p2), %vm512_vm1, %vm513_vm2 }
   0x9   : > { %vm2319_vm6 = vmor (!%p138_p2), %vm1001_vm4, %vm1002_vm5 }
   0xb   : > { %1832 = vmatpush3.bf16.msra.mxu1 (!%p138_p2), %v2015_v1  ;;  %1880 = vmatpush3.bf16.msra.mxu0 (!%p138_p2), %v2127_v3 }
   0xc   : > { %1841 = vmatprep.subr.bf16.mxu1 (!%p138_p2), %v2024_v4  ;;  %1889 = vmatprep.subr.bf16.mxu0 (!%p138_p2), %v2144_v5 }
   0xd   : > { %s2522_s13 = smov (!%p161_p3, %s1617_s13), 1 }
   0xe   : > { %s2005_s22 = smul.u32 80, %s2522_s13  ;;  %s1766_s4 = sshll.u32 %s2522_s13, 5 }
   0xf   : > { %s170_s7 = scalar_lea.vmem %s2516_s3, %s1766_s4 }
  0x10   : > { %s2138_s27 = scalar_lea.vmem %s2513_s0, %s2005_s22 }
  0x11   : > { %v173_v6 = vld [vmem:[%s2138_s27 + $0x8] sm:$0xf]  ;;  %v174_v7 = vld [vmem:[%s2138_s27 + $0x10] sm:$0xf]  ;;  %v175_v8 = vld [vmem:[%s2138_s27 + $0x18] sm:$0xf] }
  0x12   : > { %v2150_v9 = vld [vmem:[%s2138_s27 + $0x20] sm:$0xf]  ;;  %v1629_v10 = vcombine.low %v173_v6, %v174_v7  ;;  %v177_v11 = vld [vmem:[%s2138_s27 + $0x28] sm:$0xf]  ;;  %v2156_v13 = vld [vmem:[%s2138_s27 + $0x30] sm:$0xf]  ;;  %v2204_v52 = vcombine.low %v174_v7, %v175_v8 }
  0x13   : > { %v1630_v12 = vcombine.low %v175_v8, %v2150_v9  ;;  %v1631_v14 = vcombine.low %v177_v11, %v2156_v13  ;;  %v2163_v15 = vld [vmem:[%s2138_s27 + $0x38] sm:$0xf]  ;;  %v2166_v16 = vld [vmem:[%s2138_s27 + $0x40] sm:$0xf]  ;;  %v494_v17 = vld [vmem:[%s2138_s27 + $0x8] sm:$0xf]  ;;  %v2208_v59 = vcombine.low %v2150_v9, %v177_v11 }
  0x14   : > { %1833 = vmatprep.mubr.msk.bf16.mxu1 %vm223_vm0, %v1629_v10  ;;  %v2171_v18 = vld [vmem:[%s2138_s27 + $0xc] sm:$0x1]  ;;  %v496_v19 = vld [vmem:[%s2138_s27 + $0x10] sm:$0xf]  ;;  %v172_v20 = vld [vmem:[%s2138_s27] sm:$0xf]  ;;  %v1632_v21 = vcombine.low %v2163_v15, %v2166_v16 }
  0x15   : > { %1834 = vmatmul.mubr.msk.bf16.vlgmr.msra.gmra.mrb[0].mxu1 %vm223_vm0, %v1630_v12  ;;  %v2178_v22 = vld [vmem:[%s2138_s27 + $0x14] sm:$0x1]  ;;  %v498_v23 = vld [vmem:[%s2138_s27 + $0x18] sm:$0xf]  ;;  %v530_v24 = vshrl.u32 %v494_v17, 16  ;;  %v533_v26 = vshll.u32 %v494_v17, 16  ;;  %v1639_v30 = vcombine.low %v172_v20, %v173_v6 }
  0x16   : > { %1837 = vmatprep.mubr.msk.bf16.mxu1 %vm223_vm0, %v1631_v14  ;;  %1842 = vmatpush3.bf16.msra.mxu1 %v2024_v4  ;;  %v2182_v25 = vld [vmem:[%s2138_s27 + $0x1c] sm:$0x1]  ;;  %v539_v27 = vshll.u32 %v2171_v18, 16  ;;  %v544_v28 = vshrl.u32 %v496_v19, 16  ;;  %v547_v29 = vshll.u32 %v496_v19, 16  ;;  %v553_v37 = vshll.u32 %v2178_v22, 16 }
  0x17   : > { %v500_v31 = vld [vmem:[%s2138_s27 + $0x20] sm:$0xf]  ;;  %v532_v32 = vrot.slane %v530_v24, 4  ;;  %v2187_v33 = vld [vmem:[%s2138_s27 + $0x24] sm:$0x1]  ;;  %v535_v34 = vrot.slane %v533_v26, 5  ;;  %1843 = vmatprep.subr.bf16.mxu1 %v2026_v40 }
  0x18   : > { %v546_v35 = vrot.slane %v544_v28, 4  ;;  %v549_v36 = vrot.slane %v547_v29, 5  ;;  %v558_v38 = vshrl.u32 %v498_v23, 16  ;;  %v561_v39 = vshll.u32 %v498_v23, 16  ;;  %v492_v41 = vld [vmem:[%s2138_s27] sm:$0xf] }
  0x19   : > { %v502_v42 = vld [vmem:[%s2138_s27 + $0x28] sm:$0xf]  ;;  %v536_v43 = vor.u32 %v535_v34, %v532_v32  ;;  %v541_v44 = vrot.slane %v539_v27, 5  ;;  %v572_v46 = vshrl.u32 %v500_v31, 16  ;;  %v555_v48 = vrot.slane %v553_v37, 5 }
  0x1a   : > { %v550_v45 = vor.u32 %v549_v36, %v546_v35  ;;  %v560_v49 = vrot.slane %v558_v38, 4  ;;  %v563_v50 = vrot.slane %v561_v39, 5  ;;  %v567_v51 = vshll.u32 %v2182_v25, 16  ;;  %1844 = vmatpush3.bf16.msra.mxu1 %v2026_v40  ;;  %v2220_v8 = vld [vmem:[%s2138_s27 + $0x2c] sm:$0x1] }
  0x1b   : > { %v537_v53 = vrot.slane %v536_v43, 4  ;;  %v574_v55 = vrot.slane %v572_v46, 4  ;;  %v575_v57 = vshll.u32 %v500_v31, 16  ;;  %v581_v58 = vshll.u32 %v2187_v33, 16  ;;  %1853 = vmatprep.subr.bf16.mxu1 %v2031_v0  ;;  %v2032_v14 = vld [vmem:[%s2514_s1 + $0x68] sm:$0xff]  }
  0x1c   : > { %v551_v54 = vrot.slane %v550_v45, 4  ;;  %v564_v56 = vor.u32 %v563_v50, %v560_v49  ;;  %v586_v62 = vshrl.u32 %v502_v42, 16  ;;  %v589_v63 = vshll.u32 %v502_v42, 16  ;;  %v504_v20 = vld [vmem:[%s2138_s27 + $0x30] sm:$0xf] }
  0x1d   : > { %1838 = vmatmul.mubr.msk.bf16.gmra.mrb[4].mxu1 %vm223_vm0, %v1632_v21  ;;  %v2212_v60 = vsel %vm2198_vm3, %v537_v53, %v541_v44  ;;  %v516_v1 = vshrl.u32 %v492_v41, 16  ;;  %v569_v6 = vrot.slane %v567_v51, 5  ;;  %v577_v7 = vrot.slane %v575_v57, 5  ;;  %v506_v21 = vld [vmem:[%s2138_s27 + $0x38] sm:$0xf]  ;;  %v2028_v51 = vld [vmem:[%s2514_s1 + $0x20] sm:$0xff]  }
  0x1e   : > { %1845 = vmatprep.mubr.msk.bf16.mxu1 %vm223_vm0, %v1639_v30  ;;  %v556_v61 = vsel %vm2198_vm3, %v551_v54, %v555_v48  ;;  %v565_v4 = vrot.slane %v564_v56, 4  ;;  %v519_v9 = vshll.u32 %v492_v41, 16  ;;  %v588_v10 = vrot.slane %v586_v62, 4  ;;  %v2237_v28 = vld [vmem:[%s2138_s27 + $0x34] sm:$0x1]  ;;  %v2027_v44 = vld [vmem:[%s2514_s1 + $0x78] sm:$0xff]  }
  0x1f   : > { %v591_v11 = vrot.slane %v589_v63, 5  ;;  %v1678_v12 = vcombine.low %v2212_v60, %v556_v61  ;;  %v578_v17 = vor.u32 %v577_v7, %v574_v55  ;;  %v583_v19 = vrot.slane %v581_v58, 5  ;;  %v2240_v29 = vld [vmem:[%s2138_s27 + $0x4] sm:$0x1]  ;;  %v2251_v38 = vld [vmem:[%s2138_s27 + $0x3c] sm:$0x1] }
  0x20   : > { %v570_v23 = vsel %vm2198_vm3, %v565_v4, %v569_v6  ;;  %v595_v27 = vshll.u32 %v2220_v8, 16  ;;  %v518_v30 = vrot.slane %v516_v1, 4  ;;  %v521_v31 = vrot.slane %v519_v9, 5  ;;  %v508_v40 = vld [vmem:[%s2138_s27 + $0x40] sm:$0xf]  ;;  %v2257_v41 = vld [vmem:[%s2514_s1 + $0x10] sm:$0xff]  }
  0x21   : > { %1881 = vmatprep.mubr.msk.bf16.mxu0 %vm223_vm0, %v1678_v12  ;;  %v579_v24 = vrot.slane %v578_v17, 4  ;;  %v592_v26 = vor.u32 %v591_v11, %v588_v10  ;;  %v600_v32 = vshrl.u32 %v504_v20, 16  ;;  %v603_v34 = vshll.u32 %v504_v20, 16  ;;  %v2280_v4 = vld [vmem:[%s2138_s27 + $0x4c] sm:$0x1] }
  0x22   : > { %v2244_v36 = vcombine.low %v556_v61, %v570_v23  ;;  %v2248_v37 = vcombine.low %v2156_v13, %v2163_v15  ;;  %v614_v39 = vshrl.u32 %v506_v21, 16  ;;  %v525_v42 = vshll.u32 %v2240_v29, 16  ;;  %v510_v15 = vld [vmem:[%s2138_s27 + $0x48] sm:$0xf]  ;;  %v2275_v61 = vld [vmem:[%s2138_s27 + $0x44] sm:$0x1] }
  0x23   : > { %v584_v35 = vsel %vm2198_vm3, %v579_v24, %v583_v19  ;;  %v602_v45 = vrot.slane %v600_v32, 4  ;;  %v609_v13 = vshll.u32 %v2237_v28, 16  ;;  %v593_v46 = vrot.slane %v592_v26, 4  ;;  %v972_v32 = vld [vmem:[%s2138_s27 + $0x8] sm:$0xe] }
  0x24   : > { %v1679_v43 = vcombine.low %v570_v23, %v584_v35  ;;  %v597_v48 = vrot.slane %v595_v27, 5  ;;  %v605_v49 = vrot.slane %v603_v34, 5  ;;  %v616_v50 = vrot.slane %v614_v39, 4 }
  0x25   : > { %1846 = vmatmul.mubr.msk.bf16.vlgmr.msra.gmra.mrb[0].mxu1 %vm223_vm0, %v2204_v52  ;;  %v617_v53 = vshll.u32 %v506_v21, 16  ;;  %v623_v54 = vshll.u32 %v2251_v38, 16  ;;  %v628_v55 = vshrl.u32 %v508_v40, 16  ;;  %v631_v56 = vshll.u32 %v508_v40, 16 }
  0x26   : > { %1849 = vmatprep.mubr.msk.bf16.mxu1 %vm223_vm0, %v2208_v59  ;;  %1854 = vmatpush3.bf16.msra.mxu1 %v2031_v0  ;;  %v522_v57 = vor.u32 %v521_v31, %v518_v30  ;;  %v606_v58 = vor.u32 %v605_v49, %v602_v45  ;;  %v642_v62 = vshrl.u32 %v510_v15, 16  ;;  %v645_v63 = vshll.u32 %v510_v15, 16  ;;  %v971_v31 = vld [vmem:[%s2138_s27] sm:$0xe]  ;;  %v974_v49 = vld [vmem:[%s2138_s27 + $0x18] sm:$0xe] }
  0x27   : > { %1855 = vmatprep.subr.bf16.mxu1 %v2032_v14  ;;  %1882 = vmatmul.mubr.msk.bf16.vlgmr.msra.gmra.mrb[0].mxu0 %vm223_vm0, %v1679_v43  ;;  %v611_v0 = vrot.slane %v609_v13, 5  ;;  %v619_v1 = vrot.slane %v617_v53, 5  ;;  %v630_v6 = vrot.slane %v628_v55, 4  ;;  %v633_v7 = vrot.slane %v631_v56, 5  ;;  %v975_v56 = vld [vmem:[%s2138_s27 + $0x20] sm:$0xe] }
  0x28   : > { %1890 = vmatpush3.bf16.msra.mxu0 %v2144_v5  ;;  %1893 = vmatprep.mubr.msk.bf16.mxu0 %vm223_vm0, %v2244_v36  ;;  %v527_v9 = vrot.slane %v525_v42, 5  ;;  %v607_v5 = vrot.slane %v606_v58, 4  ;;  %v644_v10 = vrot.slane %v642_v62, 4  ;;  %v647_v11 = vrot.slane %v645_v63, 5  ;;  %v2037_v42 = vld [vmem:[%s2514_s1 + $0x18] sm:$0xff]  }
  0x29   : > { %1891 = vmatprep.subr.bf16.mxu0 %v2027_v44  ;;  %v620_v12 = vor.u32 %v619_v1, %v616_v50  ;;  %v634_v17 = vor.u32 %v633_v7, %v630_v6  ;;  %v637_v19 = vshll.u32 %v2275_v61, 16  ;;  %v523_v20 = vrot.slane %v522_v57, 4  ;;  %v976_v57 = vld [vmem:[%s2138_s27 + $0x28] sm:$0xe]  ;;  %v2427_v15 = vld [vmem:[%s2515_s2] sm:$0x7] }
  0x2a   : > { %1856 = vmatpush3.bf16.msra.mxu1 %v2032_v14  ;;  %v625_v14 = vrot.slane %v623_v54, 5  ;;  %v2287_v21 = vsel %vm2198_vm3, %v593_v46, %v597_v48  ;;  %v648_v23 = vor.u32 %v647_v11, %v644_v10  ;;  %v651_v24 = vshll.u32 %v2280_v4, 16  ;;  %v181_v46 = vld [vmem:[%s2138_s27 + $0x48] sm:$0xf] }
  0x2b   : > { %1865 = vmatprep.subr.bf16.mxu1 %v2257_v41  ;;  %v1006_v26 = vrot.slane %v2240_v29, 5  ;;  %v1010_v27 = vrot.slane %v2171_v18, 5  ;;  %v621_v30 = vrot.slane %v620_v12, 4  ;;  %v2299_v34 = vcombine.low %v584_v35, %v2287_v21  ;;  %v2033_v18 = vld [vmem:[%s2514_s1 + $0x28] sm:$0xff]  }
  0x2c   : > { %1892 = vmatpush3.bf16.msra.mxu0 %v2027_v44  ;;  %v635_v29 = vrot.slane %v634_v17, 4  ;;  %v639_v40 = vrot.slane %v637_v19, 5  ;;  %v649_v35 = vrot.slane %v648_v23, 4  ;;  %v653_v44 = vrot.slane %v651_v24, 5 }
  0x2d   : > { %1850 = vmatmul.mubr.msk.bf16.gmra.mrb[4].mxu1 %vm223_vm0, %v2248_v37  ;;  %1901 = vmatprep.subr.bf16.mxu0 %v2028_v51  ;;  %v2303_v39 = vsel %vm2198_vm3, %v621_v30, %v625_v14  ;;  %v1699_v45 = vrot.slane %v971_v31, 9  ;;  %v1700_v13 = vrot.slane %v972_v32, 9  ;;  %v528_v48 = vsel %vm2198_vm3, %v523_v20, %v527_v9  ;;  %v977_v9 = vld [vmem:[%s2138_s27 + $0x30] sm:$0xe]  ;;  %v2038_v20 = vld [vmem:[%s2514_s1 + $0x58] sm:$0xff]   ;;  %v2040_v31 = vld [vmem:[%s2514_s1 + $0x88] sm:$0xff]  }
  0x2e   : > { %1857 = vmatprep.mubr.msk.bf16.mxu1 %vm223_vm0, %v2204_v52  ;;  %v2294_v52 = vsel %vm2198_vm3, %v607_v5, %v611_v0  ;;  %v1653_v54 = vcombine.low %v2166_v16, %v181_v46  ;;  %v1664_v55 = vcombine.low %v528_v48, %v2212_v60  ;;  %v1014_v62 = vrot.slane %v2178_v22, 5 }
  0x2f   : > { %v2313_v43 = vcombine.low %v2294_v52, %v2303_v39  ;;  %v1007_v50 = vsel %vm2319_vm6, %v1699_v45, %v1006_v26  ;;  %v1011_v53 = vsel %vm2319_vm6, %v1700_v13, %v1010_v27  ;;  %v1702_v63 = vrot.slane %v974_v49, 9  ;;  %v979_v26 = vld [vmem:[%s2138_s27 + $0x40] sm:$0xe] }
  0x30   : > { %v1018_v0 = vrot.slane %v2182_v25, 5  ;;  %v1713_v1 = vcombine.low %v1007_v50, %v1011_v53  ;;  %v1703_v16 = vrot.slane %v975_v56, 9  ;;  %v1022_v60 = vrot.slane %v2187_v33, 5 }
  0x31   : > { %v1704_v6 = vrot.slane %v976_v57, 9  ;;  %v1026_v7 = vrot.slane %v2220_v8, 5  ;;  %v978_v8 = vld [vmem:[%s2138_s27 + $0x38] sm:$0xe]  ;;  %v1705_v11 = vrot.slane %v977_v9, 9  ;;  %v1030_v14 = vrot.slane %v2237_v28, 5 }
  0x32   : > { %v1019_v25 = vsel %vm2319_vm6, %v1702_v63, %v1018_v0  ;;  %v1023_v5 = vsel %vm2319_vm6, %v1703_v16, %v1022_v60  ;;  %v1706_v17 = vrot.slane %v978_v8, 9  ;;  %v1034_v19 = vrot.slane %v2251_v38, 5 }
  0x33   : > { %1894 = vmatmul.mubr.msk.bf16.vlgmr.msra.gmra.mrb[0].mxu0 %vm223_vm0, %v2299_v34  ;;  %v1027_v33 = vsel %vm2319_vm6, %v1704_v6, %v1026_v7  ;;  %v1031_v28 = vsel %vm2319_vm6, %v1705_v11, %v1030_v14  ;;  %v1728_v27 = vcombine.low %v1019_v25, %v1023_v5  ;;  %v1707_v30 = vrot.slane %v979_v26, 9 }
  0x34   : > { %1902 = vmatpush3.bf16.msra.mxu0 %v2028_v51  ;;  %1897 = vmatprep.mubr.msk.bf16.mxu0 %vm223_vm0, %v2313_v43  ;;  %v2034_v51 = vld [vmem:[%s2514_s1 + $0x50] sm:$0xff]   ;;  %v1715_v12 = vcombine.low %v1023_v5, %v1027_v33  ;;  %v1035_v38 = vsel %vm2319_vm6, %v1706_v17, %v1034_v19  ;;  %v1361_v46 = vlaneseq }
  0x35   : > { %1858 = vmatmul.mubr.msk.bf16.vlgmr.msra.gmra.mrb[0].mxu1 %vm223_vm0, %v2208_v59  ;;  %v973_v59 = vld [vmem:[%s2138_s27 + $0x10] sm:$0xe]  ;;  %1903 = vmatprep.subr.bf16.mxu0 %v2033_v18  ;;  %v1716_v23 = vcombine.low %v1031_v28, %v1035_v38 }
  0x36   : > { %1861 = vmatprep.mubr.msk.bf16.mxu1 %vm223_vm0, %v2248_v37  ;;  %1866 = vmatpush3.bf16.msra.mxu1 %v2257_v41  ;;  %v2336_v37 = vsel %vm2198_vm3, %v635_v29, %v639_v40  ;;  %v654_v41 = vsel %vm2198_vm3, %v649_v35, %v653_v44  ;;  %v1701_v47 = vrot.slane %v973_v59, 9 }
  0x37   : > { %1867 = vmatprep.subr.bf16.mxu1 %v2037_v42  ;;  %v1692_v58 = vcombine.low %v2336_v37, %v654_v41 }
  0x38   : > { %1904 = vmatpush3.bf16.msra.mxu0 %v2033_v18  ;;  %v1015_v22 = vsel %vm2319_vm6, %v1701_v47, %v1014_v62  ;;  %v1042_v18 = vrot.slane %v2280_v4, 5  ;;  %v2421_v4 = vshrl.u32 %v1361_v46, 7 }
  0x39   : > { %1913 = vmatprep.subr.bf16.mxu0 %v2034_v51  ;;  %v1714_v10 = vcombine.low %v1015_v22, %v1019_v25  ;;  %v1727_v24 = vcombine.low %v1011_v53, %v1015_v22 }
  0x3a   : > { %1868 = vmatpush3.bf16.msra.mxu1 %v2037_v42 }
  0x3b   : > { %1937 = vmatprep.subr.bf16.mxu1 %v2122_v2  ;;  %1898 = vmatmul.mubr.msk.bf16.gmra.mrb[4].mxu0 %vm223_vm0, %v1692_v58 }
  0x3c   : > { %1905 = vmatprep.mubr.msk.bf16.mxu0 %vm223_vm0, %v1713_v1 }
  0x3d   : > { %1862 = vmatmul.mubr.msk.bf16.gmra.mrb[4].mxu1 %vm223_vm0, %v1653_v54 }
  0x3e   : > { %1869 = vmatprep.mubr.msk.bf16.mxu1 %vm223_vm0, %v1664_v55 }
  0x43   : > { %1906 = vmatmul.mubr.msk.bf16.vlgmr.msra.gmra.mrb[0].mxu0 %vm223_vm0, %v1714_v10 }
  0x44   : > { %1914 = vmatpush3.bf16.msra.mxu0 %v2034_v51  ;;  %1909 = vmatprep.mubr.msk.bf16.mxu0 %vm223_vm0, %v1715_v12 }
  0x45   : > { %1870 = vmatmul.mubr.msk.bf16.vlgmr.msra.gmra.mrb[0].mxu1 %vm223_vm0, %v2244_v36  ;;  %1915 = vmatprep.subr.bf16.mxu0 %v2038_v20  ;;  %v2039_v36 = vld [vmem:[%s2514_s1 + $0x80] sm:$0xff]  }
  0x46   : > { %1873 = vmatprep.mubr.msk.bf16.mxu1 %vm223_vm0, %v2299_v34  ;;  %1939 = vmatpush3.bf16.msra.mxu1 %v2122_v2  ;;  %v1680_v2 = vcombine.low %v2287_v21, %v2294_v52  ;;  %v1038_v21 = vrot.slane %v2275_v61, 5  ;;  %v1681_v52 = vcombine.low %v2303_v39, %v2336_v37  ;;  %v980_v61 = vld [vmem:[%s2138_s27 + $0x48] sm:$0xe]  ;;  %v1363_v37 = vsub.s32 0, %v2421_v4 }
  0x47   : > { %1938 = vmatprep.subr.bf16.mxu1 %v2127_v3  ;;  %v1708_v39 = vrot.slane %v980_v61, 9 }
  0x48   : > { %1916 = vmatpush3.bf16.msra.mxu0 %v2038_v20  ;;  %v1039_v32 = vsel %vm2319_vm6, %v1707_v30, %v1038_v21  ;;  %v1364_v49 = vrot.slane %v2427_v15, %v1363_v37 }
  0x49   : > { %1925 = vmatprep.subr.bf16.mxu0 %v2039_v36  ;;  %v1730_v34 = vcombine.low %v1035_v38, %v1039_v32  ;;  %v1043_v29 = vsel %vm2319_vm6, %v1708_v39, %v1042_v18 }
  0x4a   : > { %1940 = vmatpush3.bf16.msra.mxu1 %v2127_v3  ;;  %v1729_v3 = vcombine.low %v1027_v33, %v1031_v28  ;;  %v1741_v40 = vcombine.low %v1039_v32, %v1043_v29 }
  0x4b   : > { %1910 = vmatmul.mubr.msk.bf16.gmra.mrb[4].mxu0 %vm223_vm0, %v1716_v23 }
  0x4c   : > { %1917 = vmatprep.mubr.msk.bf16.mxu0 %vm223_vm0, %v1727_v24 }
  0x4d   : > { %1874 = vmatmul.mubr.msk.bf16.gmra.mrb[4].mxu1 %vm223_vm0, %v2313_v43 }
  0x4e   : > { %1885 = vmatprep.mubr.msk.bf16.mxu1 %vm223_vm0, %v1680_v2 }
  0x53   : > { %1918 = vmatmul.mubr.msk.bf16.vlgmr.msra.gmra.mrb[0].mxu0 %vm223_vm0, %v1728_v27 }
  0x54   : > { %1926 = vmatpush3.bf16.msra.mxu0 %v2039_v36  ;;  %1921 = vmatprep.mubr.msk.bf16.mxu0 %vm223_vm0, %v1729_v3 }
  0x55   : > { %1927 = vmatprep.subr.bf16.mxu0 %v2040_v31 }
  0x58   : > { %1928 = vmatpush3.bf16.msra.mxu0 %v2040_v31 }
  0x59   : > { %1886 = vmatmul.mubr.msk.bf16.vlgmr.msra.gmra.mrb[4].mxu1 %vm223_vm0, %v1681_v52 }
  0x5b   : > { %1922 = vmatmul.mubr.msk.bf16.gmra.mrb[4].mxu0 %vm223_vm0, %v1730_v34 }
  0x5c   : > { %1929 = vmatprep.mubr.msk.bf16.mxu0 %vm223_vm0, %v1714_v10 }
  0x63   : > { %1930 = vmatmul.mubr.msk.bf16.vlgmr.msra.gmra.mrb[0].mxu0 %vm223_vm0, %v1715_v12 }
  0x64   : > { %1933 = vmatprep.mubr.msk.bf16.mxu0 %vm223_vm0, %v1716_v23 }
  0x6b   : > { %1934 = vmatmul.mubr.msk.bf16.gmra.mrb[4].mxu0 %vm223_vm0, %v1741_v40 }
 0x118   : > { %v1871_v42 = vpop.f32.mrb[0].mxu1 }
 0x119   : > { %v730_v43 = vpop.f32.mrb[1].mxu1 }
 0x11a   : > { %v1872_v35 = vpop.f32.mrb[2].mxu1 }
 0x11b   : > { %v733_v44 = vpop.f32.mrb[3].mxu1 }
 0x12c   : > { %v1887_v45 = vpop.f32.mrb[4].mxu1 }
 0x12d   : > { %v853_v13 = vpop.f32.mrb[5].mxu1 }
 0x12e   : > { %v1888_v48 = vpop.f32.mrb[6].mxu1 }
 0x12f   : > { %v856_v59 = vpop.f32.mrb[7].mxu1 }
 0x136   : > { %v1931_v41 = vpop.f32.mrb[0].mxu0 }
 0x137   : > { %v1941_v50 = vadd.f32 %v1931_v41, %v1871_v42  ;;  %v1321_v53 = vpop.f32.mrb[1].mxu0 }
 0x138   : > { %v1942_v51 = vadd.f32 %v1321_v53, %v730_v43  ;;  %v1932_v54 = vpop.f32.mrb[2].mxu0 }
 0x139   : > { %v1943_v55 = vadd.f32 %v1932_v54, %v1872_v35  ;;  %v1324_v56 = vpop.f32.mrb[3].mxu0  ;;  %v2432_v58 = vadd.f32 %v1941_v50, %v1364_v49 }
 0x13a   : > { %v2430_v57 = vadd.f32 %v1942_v51, %v1364_v49  ;;  %v1944_v47 = vadd.f32 %v1324_v56, %v733_v44 }
 0x13b   : > { %v2438_v0 = vadd.f32 %v1943_v55, %v1364_v49  ;;  %v1376_v22 = vsel %vm223_vm0, %v2432_v58, 0.0 }
 0x13c   : > { %v2434_v62 = vadd.f32 %v1944_v47, %v1364_v49  ;;  %v1373_v63 = vsel %vm223_vm0, %v2430_v57, 0.0 }
 0x13d   : > { %v1378_v10 = vsel %vm223_vm0, %v2438_v0, 0.0 }
 0x13e   : > { %v1374_v1 = vsel %vm223_vm0, %v2434_v62, 0.0  ;;  %v1935_v16 = vpop.f32.mrb[4].mxu0 }
 0x13f   : > { %v1375_v60 = vadd.f32 %v1374_v1, %v1373_v63  ;;  %v1945_v6 = vadd.f32 %v1935_v16, %v1887_v45  ;;  %v1337_v7 = vpop.f32.mrb[5].mxu0 }
 0x140   : > { %v1946_v25 = vadd.f32 %v1337_v7, %v853_v13  ;;  %v1936_v9 = vpop.f32.mrb[6].mxu0 }
 0x141   : > { %v1377_v5 = vadd.f32 %v1376_v22, %v1375_v60  ;;  %v1947_v33 = vadd.f32 %v1936_v9, %v1888_v48  ;;  %v1340_v8 = vpop.f32.mrb[7].mxu0  ;;  %v2448_v17 = vadd.f32 %v1945_v6, %v1364_v49 }
 0x142   : > { %v2446_v11 = vadd.f32 %v1946_v25, %v1364_v49  ;;  %v1948_v12 = vadd.f32 %v1340_v8, %v856_v59 }
 0x143   : > { %v1379_v14 = vadd.f32 %v1378_v10, %v1377_v5  ;;  %v2454_v38 = vadd.f32 %v1947_v33, %v1364_v49  ;;  %v1384_v23 = vsel %vm223_vm0, %v2448_v17, 0.0 }
 0x144   : > { %v1380_v19 = vsel %vm223_vm0, %v2446_v11, 0.0  ;;  %v2452_v20 = vadd.f32 %v1948_v12, %v1364_v49 }
 0x145   : > { %v1381_v28 = vadd.f32 %v1380_v19, %v1379_v14  ;;  %v1386_v26 = vsel %vm223_vm0, %v2454_v38, 0.0 }
 0x146   : > { %v1382_v36 = vsel %vm223_vm0, %v2452_v20, 0.0 }
 0x147   : > { %v1383_v2 = vadd.f32 %v1382_v36, %v1381_v28  ;;  %v1443_v28 = vsub.s32 1, %v2421_v4 }
 0x149   : > { %v1385_v24 = vadd.f32 %v1384_v23, %v1383_v2 }
 0x14b   : > { %v1387_v27 = vadd.f32 %v1386_v26, %v1385_v24  ;;  %v1455_v26 = vsub.s32 2, %v2421_v4 }
 0x14d   : > { %v1388_v3 = vrot.slane %v1387_v27, 4 }
 0x14f   : > { %v1389_v30 = vadd.f32 %v1388_v3, %v1387_v27 }
 0x151   : > { %v1390_v21 = vrot.slane %v1389_v30, 2 }
 0x153   : > { %v1391_v52 = vadd.f32 %v1390_v21, %v1389_v30 }
 0x155   : > { %v1392_v31 = vrot.slane %v1391_v52, 1 }
 0x157   : > { %v1393_v32 = vadd.f32 %v1392_v31, %v1391_v52 }
 0x159   : > { %v1394_v34 = vmul.f32 0.015625, %v1393_v32 }
 0x15b   : > { %v1395_v61 = vsub.f32 %v2430_v57, %v1394_v34  ;;  %v1396_v39 = vsub.f32 %v2434_v62, %v1394_v34  ;;  %v1397_v18 = vsub.f32 %v2432_v58, %v1394_v34  ;;  %v1398_v29 = vsub.f32 %v2438_v0, %v1394_v34 }
 0x15c   : > { %v1399_v40 = vsub.f32 %v2446_v11, %v1394_v34  ;;  %v1400_v44 = vsub.f32 %v2452_v20, %v1394_v34  ;;  %v1401_v59 = vsub.f32 %v2448_v17, %v1394_v34  ;;  %v1402_v50 = vsub.f32 %v2454_v38, %v1394_v34 }
 0x15d   : > { %v1403_v42 = vmul.f32 %v1395_v61, %v1395_v61  ;;  %v1404_v43 = vmul.f32 %v1396_v39, %v1396_v39  ;;  %v1405_v35 = vmul.f32 %v1397_v18, %v1397_v18  ;;  %v1406_v45 = vmul.f32 %v1398_v29, %v1398_v29 }
 0x15e   : > { %v1407_v37 = vmul.f32 %v1399_v40, %v1399_v40  ;;  %v1408_v53 = vmul.f32 %v1400_v44, %v1400_v44  ;;  %v1409_v55 = vmul.f32 %v1401_v59, %v1401_v59  ;;  %v1410_v63 = vmul.f32 %v1402_v50, %v1402_v50 }
 0x15f   : > { %v1411_v13 = vsel %vm223_vm0, %v1403_v42, 0.0  ;;  %v1412_v46 = vsel %vm223_vm0, %v1404_v43, 0.0  ;;  %v1414_v41 = vsel %vm223_vm0, %v1405_v35, 0.0  ;;  %v1416_v51 = vsel %vm223_vm0, %v1406_v45, 0.0 }
 0x160   : > { %v1413_v48 = vadd.f32 %v1412_v46, %v1411_v13  ;;  %v1418_v56 = vsel %vm223_vm0, %v1407_v37, 0.0  ;;  %v1420_v1 = vsel %vm223_vm0, %v1408_v53, 0.0  ;;  %v1422_v60 = vsel %vm223_vm0, %v1409_v55, 0.0 }
 0x161   : > { %v1424_v7 = vsel %vm223_vm0, %v1410_v63, 0.0 }
 0x162   : > { %v1415_v49 = vadd.f32 %v1414_v41, %v1413_v48 }
 0x164   : > { %v1417_v54 = vadd.f32 %v1416_v51, %v1415_v49 }
 0x166   : > { %v1419_v47 = vadd.f32 %v1418_v56, %v1417_v54 }
 0x168   : > { %v1421_v16 = vadd.f32 %v1420_v1, %v1419_v47 }
 0x16a   : > { %v1423_v6 = vadd.f32 %v1422_v60, %v1421_v16 }
 0x16c   : > { %v1425_v22 = vadd.f32 %v1424_v7, %v1423_v6 }
 0x16e   : > { %v1426_v25 = vrot.slane %v1425_v22, 4 }
 0x170   : > { %v1427_v9 = vadd.f32 %v1426_v25, %v1425_v22 }
 0x172   : > { %v1428_v5 = vrot.slane %v1427_v9, 2 }
 0x174   : > { %v1429_v33 = vadd.f32 %v1428_v5, %v1427_v9 }
 0x176   : > { %v1430_v8 = vrot.slane %v1429_v33, 1 }
 0x178   : > { %v1431_v10 = vadd.f32 %v1430_v8, %v1429_v33 }
 0x17a   : > { %v1432_v12 = vmul.f32 0.015625, %v1431_v10 }
 0x17c   : > { %v1433_v14 = vadd.f32 1e-05, %v1432_v12 }
 0x17e   : > { %2041 = vrsqrt.f32 %v1433_v14 }
 0x188   : > { %v2042_v19 = vpop.eup %2041 }
 0x189   : > { %v1435_v36 = vmul.f32 %v2042_v19, %v2427_v15 }
 0x18b   : > { %v1436_v2 = vmul.f32 %v1435_v36, %v1394_v34  ;;  %v1444_v23 = vrot.slane %v1435_v36, %v1443_v28 }
 0x18d   : > { %v1438_v24 = vrot.slane %v1436_v2, 7  ;;  %v1445_v3 = vmul.f32 %v1444_v23, %v2430_v57  ;;  %v1446_v30 = vmul.f32 %v1444_v23, %v2434_v62  ;;  %v1447_v21 = vmul.f32 %v1444_v23, %v2432_v58 }
 0x18e   : > { %v1448_v52 = vmul.f32 %v1444_v23, %v2438_v0  ;;  %v1449_v32 = vmul.f32 %v1444_v23, %v2446_v11  ;;  %v1450_v61 = vmul.f32 %v1444_v23, %v2452_v20  ;;  %v1451_v34 = vmul.f32 %v1444_v23, %v2448_v17 }
 0x18f   : > { %v1440_v27 = vsub.f32 %v2427_v15, %v1438_v24  ;;  %v1452_v15 = vmul.f32 %v1444_v23, %v2454_v38 }
 0x191   : > { %v1456_v31 = vrot.slane %v1440_v27, %v1455_v26 }
 0x193   : > { %v1457_v39 = vadd.f32 %v1456_v31, %v1445_v3  ;;  %v1458_v18 = vadd.f32 %v1456_v31, %v1446_v30  ;;  %v1459_v4 = vadd.f32 %v1456_v31, %v1447_v21  ;;  %v1460_v29 = vadd.f32 %v1456_v31, %v1448_v52 }
 0x194   : > { %v1461_v57 = vadd.f32 %v1456_v31, %v1449_v32  ;;  %v1462_v40 = vadd.f32 %v1456_v31, %v1450_v61  ;;  %v2490_v62 = vadd.f32 %v1456_v31, %v1451_v34  ;;  %v2492_v43 = vadd.f32 %v1456_v31, %v1452_v15 }
 0x195   : > { %v1748_v58 = vmul.f32 -1.442695, %v1457_v39  ;;  %v1749_v42 = vmul.f32 -1.442695, %v1458_v18  ;;  %v1750_v0 = vmul.f32 -1.442695, %v1459_v4 }
 0x196   : > { %v1751_v11 = vmul.f32 -1.442695, %v1460_v29  ;;  %v1752_v20 = vmul.f32 -1.442695, %v1461_v57  ;;  %v1753_v17 = vmul.f32 -1.442695, %v1462_v40 }
 0x197   : > { %2043 = vpow2.f32 %v1748_v58  ;;  %v1754_v35 = vmul.f32 -1.442695, %v2490_v62  ;;  %v1755_v38 = vmul.f32 -1.442695, %v2492_v43 }
 0x198   : > { %2045 = vpow2.f32 %v1749_v42 }
 0x199   : > { %2047 = vpow2.f32 %v1750_v0 }
 0x19a   : > { %2049 = vpow2.f32 %v1751_v11 }
 0x19b   : > { %2051 = vpow2.f32 %v1752_v20 }
 0x19c   : > { %2053 = vpow2.f32 %v1753_v17 }
 0x19d   : > { %2055 = vpow2.f32 %v1754_v35 }
 0x19e   : > { %2057 = vpow2.f32 %v1755_v38 }
 0x1a1   : > { %v2044_v44 = vpop.eup %2043 }
 0x1a2   : > { %v2046_v45 = vpop.eup %2045  ;;  %v1489_v13 = vadd.f32 1.0, %v2044_v44 }
 0x1a3   : > { %v2048_v46 = vpop.eup %2047  ;;  %v1490_v48 = vadd.f32 1.0, %v2046_v45 }
 0x1a4   : > { %v2050_v59 = vpop.eup %2049  ;;  %v1491_v37 = vadd.f32 1.0, %v2048_v46  ;;  %2059 = vrcp.f32 %v1489_v13 }
 0x1a5   : > { %v2052_v41 = vpop.eup %2051  ;;  %v1492_v49 = vadd.f32 1.0, %v2050_v59  ;;  %2061 = vrcp.f32 %v1490_v48 }
 0x1a6   : > { %v2054_v50 = vpop.eup %2053  ;;  %v1493_v53 = vadd.f32 1.0, %v2052_v41  ;;  %2063 = vrcp.f32 %v1491_v37 }
 0x1a7   : > { %v2056_v51 = vpop.eup %2055  ;;  %v1494_v54 = vadd.f32 1.0, %v2054_v50  ;;  %2065 = vrcp.f32 %v1492_v49 }
 0x1a8   : > { %v2058_v55 = vpop.eup %2057  ;;  %v1495_v56 = vadd.f32 1.0, %v2056_v51  ;;  %2067 = vrcp.f32 %v1493_v53 }
 0x1a9   : > { %v1496_v47 = vadd.f32 1.0, %v2058_v55  ;;  %2069 = vrcp.f32 %v1494_v54 }
 0x1aa   : > { %2071 = vrcp.f32 %v1495_v56 }
 0x1ab   : > { %2073 = vrcp.f32 %v1496_v47 }
 0x1ae   : > { %v2060_v63 = vpop.eup %2059 }
 0x1af   : > { %v2062_v1 = vpop.eup %2061  ;;  %v1513_v16 = vmul.f32 %v2060_v63, %v1457_v39 }
 0x1b0   : > { %v2064_v60 = vpop.eup %2063  ;;  %v1514_v6 = vmul.f32 %v2062_v1, %v1458_v18 }
 0x1b1   : > { %v2066_v7 = vpop.eup %2065  ;;  %v1515_v22 = vmul.f32 %v2064_v60, %v1459_v4  ;;  %v1767_v25 = vpack.c.bf16 %v1513_v16, %v1513_v16 }
 0x1b2   : > { %v2068_v9 = vpop.eup %2067  ;;  %v1516_v5 = vmul.f32 %v2066_v7, %v1460_v29  ;;  %v1768_v33 = vpack.c.bf16 %v1514_v6, %v1514_v6 }
 0x1b3   : > { %v2070_v8 = vpop.eup %2069  ;;  %v1517_v10 = vmul.f32 %v2068_v9, %v1461_v57  ;;  %v1769_v12 = vpack.c.bf16 %v1515_v22, %v1515_v22  ;;  %1554 = vst.msk [vmem:[%s170_s7] sm:$0xf] %vm1553_vm7, %v1767_v25 }
 0x1b4   : > { %v2072_v14 = vpop.eup %2071  ;;  %v1518_v19 = vmul.f32 %v2070_v8, %v1462_v40  ;;  %v1770_v28 = vpack.c.bf16 %v1516_v5, %v1516_v5  ;;  %1555 = vst.msk [vmem:[%s170_s7 + $0x4] sm:$0xf] %vm1553_vm7, %v1768_v33 }
 0x1b5   : > { %v2074_v36 = vpop.eup %2073  ;;  %v1519_v2 = vmul.f32 %v2072_v14, %v2490_v62  ;;  %v1771_v23 = vpack.c.bf16 %v1517_v10, %v1517_v10  ;;  %1556 = vst.msk [vmem:[%s170_s7 + $0x8] sm:$0xf] %vm1553_vm7, %v1769_v12 }
 0x1b6   : > { %v1520_v24 = vmul.f32 %v2074_v36, %v2492_v43  ;;  %v1772_v26 = vpack.c.bf16 %v1518_v19, %v1518_v19  ;;  %1557 = vst.msk [vmem:[%s170_s7 + $0xc] sm:$0xf] %vm1553_vm7, %v1770_v28 }
 0x1b7   : > { %v1773_v27 = vpack.c.bf16 %v1519_v2, %v1519_v2  ;;  %1558 = vst.msk [vmem:[%s170_s7 + $0x10] sm:$0xf] %vm1553_vm7, %v1771_v23 }
 0x1b8   : > { %v1774_v3 = vpack.c.bf16 %v1520_v24, %v1520_v24  ;;  %1559 = vst.msk [vmem:[%s170_s7 + $0x14] sm:$0xf] %vm1553_vm7, %v1772_v26 }
 0x1b9   : > { %1560 = vst.msk [vmem:[%s170_s7 + $0x18] sm:$0xf] %vm1553_vm7, %v1773_v27 }
 0x1ba   : > { %1561 = vst.msk [vmem:[%s170_s7 + $0x1c] sm:$0xf] %vm1553_vm7, %v1774_v3 }
 0x1bb PF: > { %s13_s12 = sadd.s32 1, %s2081_s12  }
 0x1bc   : > { %p10_p4 = scmp.ge.s32.totalorder %s13_s12, 4  }
 0x1be   :  { %12 = sbr.rel (!%p10_p4) target bundleno = 1 (0x1), region = 70 }

</bundles_post_ra>
